<compile_context>
chip_gen: v7x
topology: tpu7x:2x2x1
jax: 0.10.0
libtpu: 0.0.40
codegen_flags: <defaults>
</compile_context>

<pallas_src>
import numpy as np
import jax
import jax.numpy as jnp
from jax.experimental import pallas as pl
from jax.experimental.pallas import tpu as pltpu


def get_sobel_kernel(k=3):
    rng = np.linspace(-(k // 2), k // 2, k)
    x, y = np.meshgrid(rng, rng)
    num = x
    den = x ** 2 + y ** 2
    den[:, k // 2] = 1
    return num / den


def _make_si_kernel(tc, th, W, H_total):
    inv_denom = 1.0 / float(H_total * W)

    def kernel(x_ref, halo_ref, out_ref, s1_ref, s2_ref):
        h = pl.program_id(2)
        num_h = pl.num_programs(2)

        @pl.when(h == 0)
        def _init():
            s1_ref[...] = jnp.zeros_like(s1_ref)
            s2_ref[...] = jnp.zeros_like(s2_ref)

        x_tile = x_ref[0].astype(jnp.float32)              # (tc, th, W)
        halo = halo_ref[0][:, 0].astype(jnp.float32)       # (tc, 2, W)
        top_row = halo[:, 0:1, :]                          # row above this tile
        bot_row = halo[:, 1:2, :]                          # row below this tile

        # Vertically extended tile with its 1-row halo (zero rows at the image
        # boundary == conv2d padding=1).
        xe = jnp.concatenate([top_row, x_tile, bot_row], axis=1)  # (tc, th+2, W)

        # Horizontal Sobel taps with zero padding at the W boundary, formed
        # directly (interior slices + 1-column edge fixups; no full shifted
        # copies of xe).
        left = xe[:, :, :W - 2]        # column j-1 for j in 1..W-2
        right = xe[:, :, 2:]           # column j+1 for j in 1..W-2
        center = xe[:, :, 1:W - 1]
        # hdiff[j] = x[j+1] - x[j-1]
        hdiff = jnp.concatenate(
            [xe[:, :, 1:2], right - left, -xe[:, :, W - 2:W - 1]], axis=2)
        # hsm[j] = 0.5*x[j-1] + x[j] + 0.5*x[j+1]
        hsm = jnp.concatenate(
            [xe[:, :, 0:1] + 0.5 * xe[:, :, 1:2],
             center + 0.5 * (left + right),
             xe[:, :, W - 1:W] + 0.5 * xe[:, :, W - 2:W - 1]], axis=2)

        # Vertical combine: [0.5,1,0.5] smooth -> gx, [-1,0,1] diff -> gy.
        gx = hdiff[:, 1:th + 1, :] + 0.5 * (hdiff[:, 0:th, :] + hdiff[:, 2:th + 2, :])
        gy = hsm[:, 2:th + 2, :] - hsm[:, 0:th, :]

        val2 = gx * gx + gy * gy
        val = jnp.sqrt(val2)

        # Collapse only the row axis per step (mostly plain VPU vreg adds);
        # the cross-lane reduce over W is deferred to the finalize.
        s1_ref[...] += jnp.sum(val, axis=1, keepdims=True)    # (tc, 1, W)
        s2_ref[...] += jnp.sum(val2, axis=1, keepdims=True)   # (tc, 1, W)

        @pl.when(h == num_h - 1)
        def _finalize():
            mean = jnp.sum(s1_ref[...], axis=2) * inv_denom   # (tc, 1)
            msq = jnp.sum(s2_ref[...], axis=2) * inv_denom    # (tc, 1)
            var = jnp.maximum(msq - mean * mean, 0.0)
            out_ref[0, 0, 0, :] = jnp.sqrt(var)[:, 0]

    return kernel


def _largest_divisor_leq(n, target):
    target = max(1, min(n, target))
    for d in range(target, 0, -1):
        if n % d == 0:
            return d
    return 1


def si_forward(x, k_sobel=3, *, c_tile=None, h_tile=None,
               block_budget_bytes=2 << 20):
    """x: (N, C, H, W) float32/bfloat16 -> (N, C) float32 (matches SI.forward)."""
    assert k_sobel == 3, "Pallas SI kernel implements the 3x3 Sobel case"
    # TODO(synk): general k_sobel needs a (k//2)-row halo; only k=3 implemented.
    N, C, H, W = x.shape
    assert W >= 2

    row_step = 16 if x.dtype == jnp.bfloat16 else 8

    # ---- channel tile ----
    if c_tile is not None:
        tc = c_tile
    else:
        cap = 32
        # Keep the minimum (row_step-row) input block within the budget even
        # for very wide images.
        cap = min(cap, max(1, block_budget_bytes // max(1, row_step * W * 4)))
        if N == 1 and C > 1:
            # Keep >= 2 (n, c)-tiles so the parallel axes can shard (v7x).
            cap = min(cap, max(1, C // 2))
        tc = _largest_divisor_leq(C, cap)
    assert C % tc == 0
    num_c = C // tc

    # ---- row tile: multiple of row_step dividing H, sized to the budget ----
    if h_tile is not None:
        th = h_tile
    else:
        max_rows = max(row_step, block_budget_bytes // max(1, tc * W * 4))
        if H <= max_rows:
            th = H
        else:
            th = None
            t = (max_rows // row_step) * row_step
            while t >= row_step:
                if H % t == 0:
                    th = t
                    break
                t -= row_step
            if th is None:
                th = H
    assert H % th == 0 and (th == H or th % row_step == 0)
    num_h = H // th

    # ---- per-tile halo rows (zero rows at the image boundary == padding=1) ----
    zrow = jnp.zeros((N, C, 1, W), x.dtype)
    if num_h > 1:
        top_halo = jnp.concatenate([zrow, x[:, :, th - 1:H - 1:th, :]], axis=2)
        bot_halo = jnp.concatenate([x[:, :, th::th, :], zrow], axis=2)
    else:
        top_halo = zrow
        bot_halo = zrow
    halo = jnp.stack([top_halo, bot_halo], axis=3)     # (N, C, num_h, 2, W)

    kernel = _make_si_kernel(tc, th, W, H)

    out = pl.pallas_call(
        kernel,
        out_shape=jax.ShapeDtypeStruct((N, num_c, 1, tc), jnp.float32),
        grid=(N, num_c, num_h),
        in_specs=[
            pl.BlockSpec((1, tc, th, W), lambda n, c, h: (n, c, h, 0)),
            pl.BlockSpec((1, tc, 1, 2, W), lambda n, c, h: (n, c, h, 0, 0)),
        ],
        out_specs=pl.BlockSpec((1, 1, 1, tc), lambda n, c, h: (n, c, 0, 0)),
        scratch_shapes=[pltpu.VMEM((tc, 1, W), jnp.float32),
                        pltpu.VMEM((tc, 1, W), jnp.float32)],
        compiler_params=pltpu.CompilerParams(
            dimension_semantics=("parallel", "parallel", "arbitrary"),
            vmem_limit_bytes=48 * 1024 * 1024),
    )(x, halo)

    return out.reshape(N, C)


def _si_reference(x, k_sobel=3):
    """Pure-JAX reference (direct 9-tap conv, same math as the torch module)."""
    N, C, H, W = x.shape
    pad = k_sobel // 2
    sobel = jnp.asarray(get_sobel_kernel(k_sobel), jnp.float32)
    sobel_t = sobel.T
    xp = jnp.pad(x.astype(jnp.float32),
                 ((0, 0), (0, 0), (pad, pad), (pad, pad)))
    gx = jnp.zeros((N, C, H, W), jnp.float32)
    gy = jnp.zeros((N, C, H, W), jnp.float32)
    for dy in range(k_sobel):
        for dx in range(k_sobel):
            win = xp[:, :, dy:dy + H, dx:dx + W]
            gx = gx + sobel[dy, dx] * win
            gy = gy + sobel_t[dy, dx] * win
    val = jnp.sqrt(gx ** 2 + gy ** 2)
    denom = H * W
    out = jnp.sum(val ** 2, axis=(2, 3)) / denom - \
        (jnp.sum(val, axis=(2, 3)) / denom) ** 2
    return out ** 0.5


if __name__ == "__main__":
    key = jax.random.PRNGKey(0)
    k1, k2 = jax.random.split(key)

    # Case 1: module-sized small input (SI(inp=4, k_sobel=3)); single H tile.
    N, C, H, W = 2, 4, 16, 16
    x = jax.random.normal(k1, (N, C, H, W), dtype=jnp.float32)
    out = jax.block_until_ready(si_forward(x, k_sobel=3))
    assert out.shape == (N, C)
    ref = _si_reference(x, k_sobel=3)
    np.testing.assert_allclose(np.asarray(out), np.asarray(ref),
                               rtol=1e-4, atol=1e-5)

    # Case 2: exercise the C-tile / H-tile / halo accumulation path.
    N2, C2, H2, W2 = 2, 8, 32, 16
    x2 = jax.random.normal(k2, (N2, C2, H2, W2), dtype=jnp.float32)
    out2 = jax.block_until_ready(si_forward(x2, k_sobel=3, c_tile=4, h_tile=8))
    ref2 = _si_reference(x2, k_sobel=3)
    np.testing.assert_allclose(np.asarray(out2), np.asarray(ref2),
                               rtol=1e-4, atol=1e-5)

    print("KERNEL_OK")
</pallas_src>

<mosaic_0001>
module attributes {stable_mosaic.version = 11 : i64} {
  func.func @kernel(%arg0: i32, %arg1: i32, %arg2: i32, %arg3: memref<1x4x16x16xf32, #tpu.memory_space<vmem>>, %arg4: memref<1x4x1x2x16xf32, #tpu.memory_space<vmem>>, %arg5: memref<1x1x1x4xf32, #tpu.memory_space<vmem>>, %arg6: memref<4x1x16xf32, #tpu.memory_space<vmem>>, %arg7: memref<4x1x16xf32, #tpu.memory_space<vmem>>) attributes {dimension_semantics = [#tpu.dimension_semantics<parallel>, #tpu.dimension_semantics<parallel>, #tpu.dimension_semantics<arbitrary>], iteration_bounds = array<i64: 2, 1, 1>, scalar_prefetch = 0 : i64, scratch_operands = 2 : i64, tpu.core_type = #tpu.core_type<tc>, window_params = [{transform_indices = @transform_0, window_bounds = array<i64: 1, 4, 16, 16>}, {transform_indices = @transform_1, window_bounds = array<i64: 1, 4, 1, 2, 16>}, {transform_indices = @transform_2, window_bounds = array<i64: 1, 1, 1, 4>}]} {
    %c0_i32 = arith.constant 0 : i32
    %0 = arith.cmpi eq, %arg2, %c0_i32 : i32
    %1 = arith.extui %0 : i1 to i32
    %c0_i32_0 = arith.constant 0 : i32
    %2 = arith.cmpi ne, %1, %c0_i32_0 : i32
    scf.if %2 {
      %cst_29 = arith.constant 0.000000e+00 : f32
      %62 = vector.broadcast %cst_29 : f32 to vector<4x1x16xf32>
      %c0_30 = arith.constant 0 : index
      %c0_31 = arith.constant 0 : index
      %c0_32 = arith.constant 0 : index
      %63 = vector.load %arg6[%c0_30, %c0_31, %c0_32] : memref<4x1x16xf32, #tpu.memory_space<vmem>>, vector<4x1x16xf32>
      tpu.vector_store %arg6[%c0_30, %c0_31, %c0_32], %62 {strides = array<i32>} : memref<4x1x16xf32, #tpu.memory_space<vmem>>, vector<4x1x16xf32>,
      %cst_33 = arith.constant 0.000000e+00 : f32
      %64 = vector.broadcast %cst_33 : f32 to vector<4x1x16xf32>
      %c0_34 = arith.constant 0 : index
      %c0_35 = arith.constant 0 : index
      %c0_36 = arith.constant 0 : index
      %65 = vector.load %arg7[%c0_34, %c0_35, %c0_36] : memref<4x1x16xf32, #tpu.memory_space<vmem>>, vector<4x1x16xf32>
      tpu.vector_store %arg7[%c0_34, %c0_35, %c0_36], %64 {strides = array<i32>} : memref<4x1x16xf32, #tpu.memory_space<vmem>>, vector<4x1x16xf32>,
    } else {
    }
    %c0 = arith.constant 0 : index
    %c0_1 = arith.constant 0 : index
    %c0_2 = arith.constant 0 : index
    %c0_3 = arith.constant 0 : index
    %3 = vector.load %arg3[%c0, %c0_1, %c0_2, %c0_3] : memref<1x4x16x16xf32, #tpu.memory_space<vmem>>, vector<1x4x16x16xf32>
    %4 = vector.shape_cast %3 : vector<1x4x16x16xf32> to vector<4x16x16xf32>
    %c0_4 = arith.constant 0 : index
    %c0_5 = arith.constant 0 : index
    %c0_6 = arith.constant 0 : index
    %c0_7 = arith.constant 0 : index
    %c0_8 = arith.constant 0 : index
    %5 = vector.load %arg4[%c0_4, %c0_5, %c0_6, %c0_7, %c0_8] : memref<1x4x1x2x16xf32, #tpu.memory_space<vmem>>, vector<1x4x1x2x16xf32>
    %6 = vector.shape_cast %5 : vector<1x4x1x2x16xf32> to vector<4x1x2x16xf32>
    %7 = vector.shape_cast %6 : vector<4x1x2x16xf32> to vector<4x2x16xf32>
    %8 = vector.extract_strided_slice %7 {offsets = [0, 0, 0], sizes = [4, 1, 16], strides = [1, 1, 1]} : vector<4x2x16xf32> to vector<4x1x16xf32>
    %9 = vector.extract_strided_slice %7 {offsets = [0, 1, 0], sizes = [4, 1, 16], strides = [1, 1, 1]} : vector<4x2x16xf32> to vector<4x1x16xf32>
    %10 = tpu.concatenate %8, %4, %9 in 1 : vector<4x1x16xf32>, vector<4x16x16xf32>, vector<4x1x16xf32> -> vector<4x18x16xf32>
    %11 = vector.extract_strided_slice %10 {offsets = [0, 0, 0], sizes = [4, 18, 14], strides = [1, 1, 1]} : vector<4x18x16xf32> to vector<4x18x14xf32>
    %12 = vector.extract_strided_slice %10 {offsets = [0, 0, 2], sizes = [4, 18, 14], strides = [1, 1, 1]} : vector<4x18x16xf32> to vector<4x18x14xf32>
    %13 = vector.extract_strided_slice %10 {offsets = [0, 0, 1], sizes = [4, 18, 14], strides = [1, 1, 1]} : vector<4x18x16xf32> to vector<4x18x14xf32>
    %14 = vector.extract_strided_slice %10 {offsets = [0, 0, 1], sizes = [4, 18, 1], strides = [1, 1, 1]} : vector<4x18x16xf32> to vector<4x18x1xf32>
    %15 = arith.subf %12, %11 : vector<4x18x14xf32>
    %16 = vector.extract_strided_slice %10 {offsets = [0, 0, 14], sizes = [4, 18, 1], strides = [1, 1, 1]} : vector<4x18x16xf32> to vector<4x18x1xf32>
    %cst = arith.constant 0.000000e+00 : f32
    %17 = vector.broadcast %cst : f32 to vector<4x18x1xf32>
    %18 = arith.subf %17, %16 : vector<4x18x1xf32>
    %19 = tpu.concatenate %14, %15, %18 in 2 : vector<4x18x1xf32>, vector<4x18x14xf32>, vector<4x18x1xf32> -> vector<4x18x16xf32>
    %20 = vector.extract_strided_slice %10 {offsets = [0, 0, 0], sizes = [4, 18, 1], strides = [1, 1, 1]} : vector<4x18x16xf32> to vector<4x18x1xf32>
    %21 = vector.extract_strided_slice %10 {offsets = [0, 0, 1], sizes = [4, 18, 1], strides = [1, 1, 1]} : vector<4x18x16xf32> to vector<4x18x1xf32>
    %cst_9 = arith.constant 5.000000e-01 : f32
    %22 = vector.broadcast %cst_9 : f32 to vector<4x18x1xf32>
    %23 = arith.mulf %22, %21 : vector<4x18x1xf32>
    %24 = arith.addf %20, %23 : vector<4x18x1xf32>
    %25 = arith.addf %11, %12 : vector<4x18x14xf32>
    %cst_10 = arith.constant 5.000000e-01 : f32
    %26 = vector.broadcast %cst_10 : f32 to vector<4x18x14xf32>
    %27 = arith.mulf %26, %25 : vector<4x18x14xf32>
    %28 = arith.addf %13, %27 : vector<4x18x14xf32>
    %29 = vector.extract_strided_slice %10 {offsets = [0, 0, 15], sizes = [4, 18, 1], strides = [1, 1, 1]} : vector<4x18x16xf32> to vector<4x18x1xf32>
    %30 = vector.extract_strided_slice %10 {offsets = [0, 0, 14], sizes = [4, 18, 1], strides = [1, 1, 1]} : vector<4x18x16xf32> to vector<4x18x1xf32>
    %cst_11 = arith.constant 5.000000e-01 : f32
    %31 = vector.broadcast %cst_11 : f32 to vector<4x18x1xf32>
    %32 = arith.mulf %31, %30 : vector<4x18x1xf32>
    %33 = arith.addf %29, %32 : vector<4x18x1xf32>
    %34 = tpu.concatenate %24, %28, %33 in 2 : vector<4x18x1xf32>, vector<4x18x14xf32>, vector<4x18x1xf32> -> vector<4x18x16xf32>
    %35 = vector.extract_strided_slice %19 {offsets = [0, 1, 0], sizes = [4, 16, 16], strides = [1, 1, 1]} : vector<4x18x16xf32> to vector<4x16x16xf32>
    %36 = vector.extract_strided_slice %19 {offsets = [0, 0, 0], sizes = [4, 16, 16], strides = [1, 1, 1]} : vector<4x18x16xf32> to vector<4x16x16xf32>
    %37 = vector.extract_strided_slice %19 {offsets = [0, 2, 0], sizes = [4, 16, 16], strides = [1, 1, 1]} : vector<4x18x16xf32> to vector<4x16x16xf32>
    %38 = arith.addf %36, %37 : vector<4x16x16xf32>
    %cst_12 = arith.constant 5.000000e-01 : f32
    %39 = vector.broadcast %cst_12 : f32 to vector<4x16x16xf32>
    %40 = arith.mulf %39, %38 : vector<4x16x16xf32>
    %41 = arith.addf %35, %40 : vector<4x16x16xf32>
    %42 = vector.extract_strided_slice %34 {offsets = [0, 2, 0], sizes = [4, 16, 16], strides = [1, 1, 1]} : vector<4x18x16xf32> to vector<4x16x16xf32>
    %43 = vector.extract_strided_slice %34 {offsets = [0, 0, 0], sizes = [4, 16, 16], strides = [1, 1, 1]} : vector<4x18x16xf32> to vector<4x16x16xf32>
    %44 = arith.subf %42, %43 : vector<4x16x16xf32>
    %45 = arith.mulf %41, %41 : vector<4x16x16xf32>
    %46 = arith.mulf %44, %44 : vector<4x16x16xf32>
    %47 = arith.addf %45, %46 : vector<4x16x16xf32>
    %48 = math.sqrt %47 : vector<4x16x16xf32>
    %c0_13 = arith.constant 0 : index
    %c0_14 = arith.constant 0 : index
    %c0_15 = arith.constant 0 : index
    %49 = vector.load %arg6[%c0_13, %c0_14, %c0_15] : memref<4x1x16xf32, #tpu.memory_space<vmem>>, vector<4x1x16xf32>
    %cst_16 = arith.constant dense<0.000000e+00> : vector<4x16xf32>
    %50 = vector.multi_reduction <add>, %48, %cst_16 [1] : vector<4x16x16xf32> to vector<4x16xf32>
    %51 = vector.shape_cast %50 : vector<4x16xf32> to vector<4x1x16xf32>
    %52 = arith.addf %49, %51 : vector<4x1x16xf32>
    %c0_17 = arith.constant 0 : index
    %c0_18 = arith.constant 0 : index
    %c0_19 = arith.constant 0 : index
    %53 = vector.load %arg6[%c0_17, %c0_18, %c0_19] : memref<4x1x16xf32, #tpu.memory_space<vmem>>, vector<4x1x16xf32>
    tpu.vector_store %arg6[%c0_17, %c0_18, %c0_19], %52 {strides = array<i32>} : memref<4x1x16xf32, #tpu.memory_space<vmem>>, vector<4x1x16xf32>,
    %c0_20 = arith.constant 0 : index
    %c0_21 = arith.constant 0 : index
    %c0_22 = arith.constant 0 : index
    %54 = vector.load %arg7[%c0_20, %c0_21, %c0_22] : memref<4x1x16xf32, #tpu.memory_space<vmem>>, vector<4x1x16xf32>
    %cst_23 = arith.constant dense<0.000000e+00> : vector<4x16xf32>
    %55 = vector.multi_reduction <add>, %47, %cst_23 [1] : vector<4x16x16xf32> to vector<4x16xf32>
    %56 = vector.shape_cast %55 : vector<4x16xf32> to vector<4x1x16xf32>
    %57 = arith.addf %54, %56 : vector<4x1x16xf32>
    %c0_24 = arith.constant 0 : index
    %c0_25 = arith.constant 0 : index
    %c0_26 = arith.constant 0 : index
    %58 = vector.load %arg7[%c0_24, %c0_25, %c0_26] : memref<4x1x16xf32, #tpu.memory_space<vmem>>, vector<4x1x16xf32>
    tpu.vector_store %arg7[%c0_24, %c0_25, %c0_26], %57 {strides = array<i32>} : memref<4x1x16xf32, #tpu.memory_space<vmem>>, vector<4x1x16xf32>,
    %c0_i32_27 = arith.constant 0 : i32
    %59 = arith.cmpi eq, %arg2, %c0_i32_27 : i32
    %60 = arith.extui %59 : i1 to i32
    %c0_i32_28 = arith.constant 0 : i32
    %61 = arith.cmpi ne, %60, %c0_i32_28 : i32
    scf.if %61 {
      %c0_29 = arith.constant 0 : index
      %c0_30 = arith.constant 0 : index
      %c0_31 = arith.constant 0 : index
      %62 = vector.load %arg6[%c0_29, %c0_30, %c0_31] : memref<4x1x16xf32, #tpu.memory_space<vmem>>, vector<4x1x16xf32>
      %cst_32 = arith.constant dense<0.000000e+00> : vector<4x1xf32>
      %63 = vector.multi_reduction <add>, %62, %cst_32 [2] : vector<4x1x16xf32> to vector<4x1xf32>
      %cst_33 = arith.constant 3.906250e-03 : f32
      %64 = vector.broadcast %cst_33 : f32 to vector<4x1xf32>
      %65 = arith.mulf %63, %64 : vector<4x1xf32>
      %c0_34 = arith.constant 0 : index
      %c0_35 = arith.constant 0 : index
      %c0_36 = arith.constant 0 : index
      %66 = vector.load %arg7[%c0_34, %c0_35, %c0_36] : memref<4x1x16xf32, #tpu.memory_space<vmem>>, vector<4x1x16xf32>
      %cst_37 = arith.constant dense<0.000000e+00> : vector<4x1xf32>
      %67 = vector.multi_reduction <add>, %66, %cst_37 [2] : vector<4x1x16xf32> to vector<4x1xf32>
      %cst_38 = arith.constant 3.906250e-03 : f32
      %68 = vector.broadcast %cst_38 : f32 to vector<4x1xf32>
      %69 = arith.mulf %67, %68 : vector<4x1xf32>
      %70 = arith.mulf %65, %65 : vector<4x1xf32>
      %71 = arith.subf %69, %70 : vector<4x1xf32>
      %cst_39 = arith.constant 0.000000e+00 : f32
      %72 = vector.broadcast %cst_39 : f32 to vector<4x1xf32>
      %73 = arith.maximumf %71, %72 : vector<4x1xf32>
      %74 = math.sqrt %73 : vector<4x1xf32>
      %75 = vector.shape_cast %74 : vector<4x1xf32> to vector<4xf32>
      %c0_40 = arith.constant 0 : index
      %c0_41 = arith.constant 0 : index
      %c0_42 = arith.constant 0 : index
      %c0_43 = arith.constant 0 : index
      %76 = vector.load %arg5[%c0_40, %c0_41, %c0_42, %c0_43] : memref<1x1x1x4xf32, #tpu.memory_space<vmem>>, vector<1x1x1x4xf32>
      %77 = vector.shape_cast %76 : vector<1x1x1x4xf32> to vector<4xf32>
      %78 = vector.shape_cast %75 : vector<4xf32> to vector<1x1x1x4xf32>
      tpu.vector_store %arg5[%c0_40, %c0_41, %c0_42, %c0_43], %78 {strides = array<i32>} : memref<1x1x1x4xf32, #tpu.memory_space<vmem>>, vector<1x1x1x4xf32>,
    } else {
    }
    return
  }
  func.func @transform_0(%arg0: i32, %arg1: i32, %arg2: i32) -> (i32, i32, i32, i32) {
    %c0_i32 = arith.constant 0 : i32
    %c0_i32_0 = arith.constant 0 : i32
    return %arg0, %arg1, %arg2, %c0_i32 : i32, i32, i32, i32
  }
  func.func @transform_1(%arg0: i32, %arg1: i32, %arg2: i32) -> (i32, i32, i32, i32, i32) {
    %c0_i32 = arith.constant 0 : i32
    %c0_i32_0 = arith.constant 0 : i32
    %c0_i32_1 = arith.constant 0 : i32
    return %arg0, %arg1, %arg2, %c0_i32, %c0_i32_0 : i32, i32, i32, i32, i32
  }
  func.func @transform_2(%arg0: i32, %arg1: i32, %arg2: i32) -> (i32, i32, i32, i32) {
    %c0_i32 = arith.constant 0 : i32
    %c0_i32_0 = arith.constant 0 : i32
    %c0_i32_1 = arith.constant 0 : i32
    return %arg0, %arg1, %c0_i32, %c0_i32_0 : i32, i32, i32, i32
  }
}

</mosaic_0001>

<bundles_post_ra>
// kernel: tpu_custom_call.1
= control target key start
LH: loop header
LB: loop body
LE: loop exit
PB: predicated region body
PF: predicated region fallthrough
CT: control target
= control target key end

     0   :  { %7 = vsyncpa [#allocation5], 0  ;;  %s2830_s0 = inlined_call_operand.hbm [shape: f32[2,4,16,16], index: 0, kind: input, shape index: {}]   ;;  %s2831_s1 = inlined_call_operand.hbm [shape: f32[2,4,1,2,16], index: 1, kind: input, shape index: {}]   ;;  %s2832_s2 = inlined_call_operand.hbm [shape: f32[2,1,1,4], index: 2, kind: output, shape index: {}]  }
   0x1   :  { %9 = vsyncpa [#allocation5 + $0x1], 0 }
   0x2   :  { %10 = vsyncpa [#allocation8], 0 }
   0x3   :  { %12 = vsyncpa [#allocation8 + $0x1], 0 }
   0x4   :  { %13 = vsyncpa [#allocation6], 0 }
   0x5   :  { %15 = vsyncpa [#allocation6 + $0x1], 0  ;;  %s1816_s9 = smov 0   ;;  %s1818_s10 = smov 0  }
   0x6   :  { %s1820_s11 = smov 0   ;;  %s1822_s12 = smov 0  }
   0x7   :  { %s1824_s13 = smov 0   ;;  %s1826_s14 = smov 0  }
   0x8 LB: > { %s1515_s15 = sadd.s32 4294967295, %s1787_s14   ;;  %s1516_s16 = sadd.s32 4294967294, %s1787_s14   ;;  %s1787_s14 = sphi %s1826_s14, %s21_s14   ;;  %s1783_s13 = sphi %s1824_s13, %s2850_s13   ;;  %s1779_s12 = sphi %s1822_s12, %s2849_s12   ;;  %s1775_s11 = sphi %s1820_s11, %s2848_s11   ;;  %s1771_s10 = sphi %s1818_s10, %s2847_s10   ;;  %s1767_s9 = sphi %s1816_s9, %s2846_s9  }
   0x9   : > { %s40_s17 = sadd.s32 1, %s1783_s13  ;;  %s51_s18 = sadd.s32 1, %s1775_s11 }
   0xa   : > { %p42_p0 = scmp.ge.s32.totalorder %s40_s17, 2  ;;  %p58_p1 = scmp.ne.s32.totalorder %s1775_s11, %s1771_s10 }
   0xb   : > { %p59_p2 = scmp.eq.s32.totalorder %s1787_s14, 0  ;;  %p64_p3 = scmp.ne.s32.totalorder %s1771_s10, %s1767_s9 }
   0xc   : > { %s2852_s17 = smov (%p42_p0, %s40_s17), 0  ;;  %p65_p5 = scmp.eq.s32.totalorder %s1515_s15, 0 }
   0xd   : > { %p1857_p4 = por %p59_p2, %p58_p1  ;;  %s44_s20 = ssub.s32 %s1783_s13, %s2852_s17 }
   0xe   : > { %p120_p6 = scmp.eq.s32.totalorder %s1515_s15, 1  ;;  %p49_p7 = scmp.eq.s32.totalorder %s44_s20, 0 }
   0xf   : > { %p1863_p8 = por %p65_p5, %p64_p3  ;;  %p126_p10 = scmp.eq.s32.totalorder %s1516_s16, 1 }
  0x10   : > { %p1867_p9 = por %p120_p6, %p58_p1  ;;  %p1550_p13 = scmp.lt.s32.totalorder %s1787_s14, 2 }
  0x11   : > { %s2836_s21 = scalar_select %p1863_p8, 1, 0 }
  0x12   : > { %s2837_s22 = scalar_select %p1867_p9, 1, 0 }
  0x13   : > { %s1872_s23 = scalar_select %p49_p7, %s1775_s11, %s51_s18  }
  0x14   : > { %p1874_p11 = por %p126_p10, %p64_p3  ;;  %s1881_s25 = sand.u32 1, %s1775_s11  }
  0x15   : > { %s1519_s26 = sshll.u32 %s1881_s25, 6  ;;  %s1531_s27 = sshll.u32 %s1783_s13, 10 }
  0x16   : > { %s2838_s24 = scalar_select %p1874_p11, 1, 0 }
  0x17   : > { %s1888_s30 = scalar_lea.hbm %s2830_s0, %s1531_s27  ;;  %s150_s3 = scalar_lea.vmem [#allocation4], %s1519_s26 }
  0x18   : > { %s162_s4 = sshll.u32 %s150_s3, 4  ;;  %p1894_p0 = pnand %p1550_p13, %p1857_p4  ;;  %s1890_s4 = int_to_ptr.vmem [resolvable:$true] %s162_s4 }
  0x19   : > { %s147_s6 = scalar_lea.sflag [#allocation5], %s1881_s25  ;;  %s1641_s7 = scalar_lea.hbm %s1888_s30, 1024 }
  0x1a   : > { %p1642_p2 = scmp.ne.s32.totalorder %s1888_s30, %s1641_s7  ;;  %p1643_p3 = pneg %p1894_p0 }
  0x1b   : > { %s1646_s16 = scalar_lea.hbm %s2830_s0, 2048  ;;  %p1647_p4 = scmp.lt.u32.totalorder %s1888_s30, %s2830_s0 }
  0x1c   : > { %p1644_p5 = pnand %p1643_p3, %p1642_p2  ;;  %p1648_p7 = scmp.lt.u32.totalorder %s1646_s16, %s1641_s7 }
  0x1d   : > { %p1650_p13 = scmp.lt.u32.totalorder %s1641_s7, %s1888_s30 }
  0x1e   : > { %p1645_p6 = pneg %p1644_p5  ;;  %p1649_p10 = por %p1648_p7, %p1647_p4 }
  0x20   : > { %p1651_p12 = por %p1650_p13, %p1649_p10 }
  0x22   : > { %p1652_p1 = pnand %p1651_p12, %p1645_p6 }
  0x24   : > { %1655 = shalt.err (!%p1652_p1)
}
  0x25   : > { %s1656_s20 = scalar_lea.vmem %s1890_s4, 1024  ;;  %s1789_s26 = smov [#allocation4]  }
  0x26   : > { %p1657_p2 = scmp.ne.s32.totalorder %s1890_s4, %s1656_s20  ;;  %s1661_s27 = sshll.u32 %s1789_s26, 4  ;;  %s1662_s27 = int_to_ptr.vmem [resolvable:$false] %s1661_s27 }
  0x27   : > { %s1663_s28 = scalar_lea.vmem %s1662_s27, 2048  ;;  %p1664_p9 = scmp.lt.s32.totalorder %s1890_s4, %s1662_s27 }
  0x28   : > { %p1659_p5 = pnand %p1657_p2, %p1643_p3  ;;  %p1665_p4 = scmp.lt.s32.totalorder %s1663_s28, %s1656_s20 }
  0x2a   : > { %p1660_p11 = pneg %p1659_p5  ;;  %p1666_p7 = por %p1665_p4, %p1664_p9 }
  0x2c   : > { %p1667_p10 = pnand %p1666_p7, %p1660_p11 }
  0x2e   : > { %1670 = shalt.err (!%p1667_p10)
}
  0x2f   : > { %s1790_s29 = smov 128   ;;  %s1791_s3 = smov 8  }
  0x30   : > { %1542 = dma.hbm_to_vmem [thread:$0]  (!%p1894_p0), %s1888_s30, 1024, %s1890_s4, %s147_s6, %s1790_s29, %s1790_s29, %s1791_s3  }
  0x31   : > { %p194_p12 = scmp.lt.s32.totalorder %s1787_s14, 3  ;;  %s1522_s7 = sshll.u32 %s1881_s25, 3 }
  0x32   : > { %s1532_s8 = sshll.u32 %s1783_s13, 7  ;;  %p2840_p9 = scmp.ge.s32.totalorder %s1787_s14, 1 }
  0x33   : > { %s1939_s19 = scalar_lea.hbm %s2831_s1, %s1532_s8  ;;  %s176_s20 = scalar_lea.vmem [#allocation7], %s1522_s7 }
  0x34   : > { %p1932_p11 = pnand %p2840_p9, %p194_p12  ;;  %s186_s26 = sshll.u32 %s176_s20, 4  ;;  %s1941_s26 = int_to_ptr.vmem [resolvable:$true] %s186_s26 }
  0x35   : > { %s173_s30 = scalar_lea.sflag [#allocation8], %s1881_s25  ;;  %s1671_s4 = scalar_lea.hbm %s1939_s19, 128 }
  0x36   : > { %p1672_p1 = scmp.ne.s32.totalorder %s1939_s19, %s1671_s4  ;;  %s1676_s28 = scalar_lea.hbm %s2831_s1, 256 }
  0x37   : > { %p1677_p2 = scmp.lt.u32.totalorder %s1939_s19, %s2831_s1  ;;  %p1678_p5 = scmp.lt.u32.totalorder %s1676_s28, %s1671_s4 }
  0x38   : > { %p1674_p6 = pnand %p1672_p1, %p1643_p3  ;;  %p1680_p7 = scmp.lt.u32.totalorder %s1671_s4, %s1939_s19 }
  0x39   : > { %p1679_p4 = por %p1678_p5, %p1677_p2 }
  0x3a   : > { %p1675_p13 = pneg %p1674_p6 }
  0x3b   : > { %p1681_p10 = por %p1680_p7, %p1679_p4 }
  0x3d   : > { %p1682_p12 = pnand %p1681_p10, %p1675_p13 }
  0x3f   : > { %1685 = shalt.err (!%p1682_p12)
}
  0x40   : > { %s1686_s7 = scalar_lea.vmem %s1941_s26, 128  ;;  %s1792_s8 = smov [#allocation7]  }
  0x41   : > { %p1687_p9 = scmp.ne.s32.totalorder %s1941_s26, %s1686_s7  ;;  %s1691_s16 = sshll.u32 %s1792_s8, 4  ;;  %s1692_s16 = int_to_ptr.vmem [resolvable:$false] %s1691_s16 }
  0x42   : > { %s1693_s18 = scalar_lea.vmem %s1692_s16, 256  ;;  %p1694_p8 = scmp.lt.s32.totalorder %s1941_s26, %s1692_s16 }
  0x43   : > { %p1689_p1 = pnand %p1687_p9, %p1643_p3  ;;  %p1695_p2 = scmp.lt.s32.totalorder %s1693_s18, %s1686_s7 }
  0x45   : > { %p1690_p6 = pneg %p1689_p1  ;;  %p1696_p5 = por %p1695_p2, %p1694_p8 }
  0x47   : > { %p1697_p4 = pnand %p1696_p5, %p1690_p6 }
  0x49   : > { %1700 = shalt.err (!%p1697_p4)
}
  0x4a   : > { %s1793_s20 = smov 32   ;;  %s1794_s4 = smov 2  }
  0x4b   : > { %1545 = dma.hbm_to_vmem [thread:$0]  (!%p1894_p0), %s1939_s19, 128, %s1941_s26, %s173_s30, %s1793_s20, %s1793_s20, %s1794_s4  }
  0x4c   : > { %198 = sbr.rel (%p1932_p11) target bundleno = 674 (0x2a2), region = 28  ;;  %s1972_s6 = sand.u32 (!%p1932_p11), 1, %s1771_s10  }
  0x4d   : > { %s1526_s27 = sshll.u32 (!%p1932_p11), %s1972_s6, 6  ;;  %s201_s28 = scalar_lea.sflag (!%p1932_p11), [#allocation5], %s1972_s6 }
  0x4e   : > { %s1976_s29 = scalar_lea.vmem (!%p1932_p11), [#allocation4], %s1526_s27  ;;  %p2842_p8 = scmp.ne.s32.totalorder (!%p1932_p11), %s2836_s21, 0 }
  0x53   : > { %1754 = dma.done.wait (%p2842_p8), %s201_s28, 1024  }
  0x54   : > { %1756 = vsyncadd (%p2842_p8), %s201_s28, 4294966272  ;;  %s1527_s25 = sshll.u32 %s1972_s6, 3  ;;  %s210_s5 = scalar_lea.sflag [#allocation8], %s1972_s6 }
  0x55   : > { %s1984_s15 = scalar_lea.vmem [#allocation7], %s1527_s25 }
  0x56   : > { %1758 = dma.done.wait (%p2842_p8), %s210_s5, 128  }
  0x57   : > { %1760 = vsyncadd (%p2842_p8), %s210_s5, 4294967168  ;;  %v257_v0 = vld [vmem:[%s1976_s29 + $0x18] sm:$0xff]  ;;  %v263_v1 = vld [vmem:[%s1984_s15 + $0x2] sm:$0x3]  ;;  %vm274_vm0 = vcmask 1040384   ;;  %s1795_s21 = smov 2  }
  0x58   : > { %v256_v2 = vld [vmem:[%s1976_s29 + $0x10] sm:$0xff]  ;;  %v279_v3 = vrot.slane %v257_v0, 7  ;;  %v258_v5 = vld [vmem:[%s1976_s29 + $0x20] sm:$0xff]  ;;  %v259_v11 = vld [vmem:[%s1976_s29 + $0x28] sm:$0xff]  ;;  %s1796_s19 = smov 126   ;;  %s1797_s26 = smov 127  }
  0x59   : > { %v278_v4 = vrot.slane %v256_v2, 7  ;;  %v281_v9 = vrot.slane %v258_v5, 7  ;;  %v264_v10 = vld [vmem:[%s1984_s15 + $0x4] sm:$0x3]  ;;  %v282_v13 = vrot.slane %v259_v11, 7  ;;  %v260_v21 = vld [vmem:[%s1976_s29 + $0x30] sm:$0xff] }
  0x5a   : > { %v1995_v6 = vsel %vm274_vm0, %v279_v3, %v263_v1  ;;  %v254_v16 = vld [vmem:[%s1976_s29] sm:$0xff]  ;;  %v255_v17 = vld [vmem:[%s1976_s29 + $0x8] sm:$0xff]  ;;  %v284_v24 = vrot.slane %v260_v21, 7  ;;  %v261_v26 = vld [vmem:[%s1976_s29 + $0x38] sm:$0xff]  ;;  %s1798_s30 = smov 1   ;;  %vm245_vm1 = vcmask 122880  }
  0x5b   : > { %v1998_v7 = vsel %vm274_vm0, %v263_v1, %v278_v4  ;;  %325 = vrot.lane.b32.xlu1 %v1995_v6, %s1795_s21  ;;  %v2005_v8 = vsel %vm274_vm0, %v278_v4, %v279_v3  ;;  %v2014_v12 = vsel %vm274_vm0, %v264_v10, %v281_v9  ;;  %v2021_v14 = vsel %vm274_vm0, %v282_v13, %v264_v10  ;;  %v262_v20 = vld [vmem:[%s1984_s15] sm:$0x3]  ;;  %v265_v25 = vld [vmem:[%s1984_s15 + $0x6] sm:$0x3]  ;;  %s1528_s3 = sshll.u32 %s1779_s12, 4  ;;  %s237_s7 = scalar_lea.vmem [#allocation9], %s1972_s6 }
  0x5c   : > { %321 = vrot.lane.b32.xlu0 %v1998_v7, %s1795_s21  ;;  %v2024_v15 = vsel %vm274_vm0, %v281_v9, %v282_v13  ;;  %v275_v18 = vrot.slane %v254_v16, 7  ;;  %v276_v19 = vrot.slane %v255_v17, 7  ;;  %v2054_v28 = vsel %vm274_vm0, %v265_v25, %v284_v24  ;;  %s1405_s8 = sshll.u32 %s237_s7, 4  ;;  %s2781_s20 = scalar_lea.hbm %s2832_s2, %s1528_s3  ;;  %s2783_s8 = int_to_ptr.vmem [resolvable:$true] %s1405_s8 }
  0x5d   : > { %v285_v29 = vrot.slane %v261_v26, 7  ;;  %v367_v32 = vsub.f32 0.0, %v2005_v8  ;;  %v366_v33 = vsub.f32 0.0, %v1998_v7  ;;  %v368_v34 = vsub.f32 0.0, %v1995_v6  ;;  %s1392_s4 = scalar_lea.sflag [#allocation6], %s1972_s6  ;;  %s1701_s27 = scalar_lea.vmem %s2783_s8, 16 }
  0x5e   : > { %v2039_v22 = vsel %vm274_vm0, %v262_v20, %v275_v18  ;;  %v2042_v23 = vsel %vm274_vm0, %v275_v18, %v276_v19  ;;  %v2051_v27 = vsel %vm274_vm0, %v276_v19, %v262_v20  ;;  %v369_v35 = vsub.f32 0.0, %v2014_v12  ;;  %p1702_p0 = scmp.ne.s32.totalorder %s2783_s8, %s1701_s27  ;;  %p2843_p3 = scmp.ne.s32.totalorder %s2837_s22, 0 }
  0x5f   : > { %611 = vrot.lane.b32.xlu1 %v1998_v7, %s1796_s19  ;;  %v2061_v30 = vsel %vm274_vm0, %v284_v24, %v285_v29  ;;  %v2064_v31 = vsel %vm274_vm0, %v285_v29, %v265_v25  ;;  %v371_v36 = vsub.f32 0.0, %v2021_v14  ;;  %v2119_v37 = vmul.f32 0.5, %v2005_v8  ;;  %s1800_s12 = smov [#allocation9]  }
  0x60   : > { %323 = vrot.lane.b32.xlu0 %v2005_v8, %s1795_s21  ;;  %v370_v38 = vsub.f32 0.0, %v2024_v15  ;;  %v364_v39 = vsub.f32 0.0, %v2042_v23  ;;  %v2129_v40 = vmul.f32 0.5, %v1998_v7  ;;  %v372_v41 = vsub.f32 0.0, %v2054_v28  ;;  %p1703_p11 = pnand %p1702_p0, %p2843_p3  ;;  %s1705_s28 = sshll.u32 %s1800_s12, 4  ;;  %s1706_s28 = int_to_ptr.vmem [resolvable:$false] %s1705_s28 }
  0x61   : > { %v363_v42 = vsub.f32 0.0, %v2039_v22  ;;  %v374_v43 = vsub.f32 0.0, %v2064_v31  ;;  %v365_v44 = vsub.f32 0.0, %v2051_v27  ;;  %v2142_v45 = vmul.f32 0.5, %v2024_v15  ;;  %s1707_s29 = scalar_lea.vmem %s1706_s28, 32  ;;  %p1708_p7 = scmp.lt.s32.totalorder %s2783_s8, %s1706_s28 }
  0x62   : > { %v373_v46 = vsub.f32 0.0, %v2061_v30  ;;  %v2150_v47 = vmul.f32 0.5, %v2014_v12  ;;  %vm507_vm2 = vcmask 7168   ;;  %vm520_vm3 = vcmask 121856   ;;  %p1704_p13 = pneg %p1703_p11  ;;  %p1709_p10 = scmp.lt.s32.totalorder %s1707_s29, %s1701_s27 }
  0x63   : > { %327 = vrot.lane.b32.xlu1 %v2014_v12, %s1795_s21  ;;  %vm809_vm4 = vcmask 1045504   ;;  %vm906_vm5 = vcmask 1041408   ;;  %vm979_vm6 = vcmask 1046528   ;;  %vm1152_vm9 = vcmask 130048  }
  0x64   : > { %613 = vrot.lane.b32.xlu0 %v2005_v8, %s1796_s19  ;;  %p1710_p12 = por %p1709_p10, %p1708_p7 }
  0x66   : > { %p1711_p9 = pnand %p1710_p12, %p1704_p13 }
  0x67   : > { %331 = vrot.lane.b32.xlu1 %v2021_v14, %s1795_s21 }
  0x68   : > { %329 = vrot.lane.b32.xlu0 %v2024_v15, %s1795_s21 }
  0x6b   : > { %619 = vrot.lane.b32.xlu1 %v2024_v15, %s1796_s19 }
  0x6c   : > { %617 = vrot.lane.b32.xlu0 %v2014_v12, %s1796_s19 }
  0x6f   : > { %317 = vrot.lane.b32.xlu1 %v2042_v23, %s1795_s21 }
  0x70   : > { %315 = vrot.lane.b32.xlu0 %v2039_v22, %s1795_s21 }
  0x73   : > { %333 = vrot.lane.b32.xlu1 %v2054_v28, %s1795_s21 }
  0x74   : > { %319 = vrot.lane.b32.xlu0 %v2051_v27, %s1795_s21 }
  0x77   : > { %337 = vrot.lane.b32.xlu1 %v2064_v31, %s1795_s21 }
  0x78   : > { %335 = vrot.lane.b32.xlu0 %v2061_v30, %s1795_s21 }
  0x7b   : > { %607 = vrot.lane.b32.xlu1 %v2042_v23, %s1796_s19 }
  0x7c   : > { %605 = vrot.lane.b32.xlu0 %v2039_v22, %s1796_s19 }
  0x7f   : > { %625 = vrot.lane.b32.xlu1 %v2061_v30, %s1796_s19 }
  0x80   : > { %623 = vrot.lane.b32.xlu0 %v2054_v28, %s1796_s19 }
  0x83   : > { %621 = vrot.lane.b32.xlu1 %v2021_v14, %s1796_s19 }
  0x84   : > { %615 = vrot.lane.b32.xlu0 %v1995_v6, %s1796_s19 }
  0x87   : > { %627 = vrot.lane.b32.xlu1 %v2064_v31, %s1796_s19 }
  0x88   : > { %609 = vrot.lane.b32.xlu0 %v2051_v27, %s1796_s19 }
  0x8b   : > { %383 = vrot.lane.b32.xlu1 %v2005_v8, %s1797_s26 }
  0x8c   : > { %381 = vrot.lane.b32.xlu0 %v1998_v7, %s1797_s26 }
  0x8f   : > { %389 = vrot.lane.b32.xlu1 %v2024_v15, %s1797_s26 }
  0x90   : > { %385 = vrot.lane.b32.xlu0 %v1995_v6, %s1797_s26 }
  0x93   : > { %479 = vrot.lane.b32.xlu1 %v367_v32, %s1798_s30 }
  0x94   : > { %387 = vrot.lane.b32.xlu0 %v2014_v12, %s1797_s26 }
  0x97   : > { %375 = vrot.lane.b32.xlu1 %v2039_v22, %s1797_s26 }
  0x98   : > { %391 = vrot.lane.b32.xlu0 %v2021_v14, %s1797_s26 }
  0x9b   : > { %379 = vrot.lane.b32.xlu1 %v2051_v27, %s1797_s26 }
  0x9c   : > { %477 = vrot.lane.b32.xlu0 %v366_v33, %s1798_s30 }
  0x9f   : > { %395 = vrot.lane.b32.xlu1 %v2061_v30, %s1797_s26 }
  0xa0   : > { %481 = vrot.lane.b32.xlu0 %v368_v34, %s1798_s30 }
  0xa3   : > { %483 = vrot.lane.b32.xlu1 %v369_v35, %s1798_s30 }
  0xa4   : > { %377 = vrot.lane.b32.xlu0 %v2042_v23, %s1797_s26 }
  0xa7   : > { %487 = vrot.lane.b32.xlu1 %v371_v36, %s1798_s30 }
  0xa8   : > { %393 = vrot.lane.b32.xlu0 %v2054_v28, %s1797_s26 }
  0xab   : > { %565 = vrot.lane.b32.xlu1 %v2119_v37, %s1797_s26 }
  0xac   : > { %397 = vrot.lane.b32.xlu0 %v2064_v31, %s1797_s26 }
  0xaf   : > { %473 = vrot.lane.b32.xlu1 %v364_v39, %s1798_s30  ;;  %v533_v39 = vmul.f32 0.5, %v2039_v22 }
  0xb0   : > { %485 = vrot.lane.b32.xlu0 %v370_v38, %s1798_s30 }
  0xb3   : > { %489 = vrot.lane.b32.xlu1 %v372_v41, %s1798_s30  ;;  %v534_v41 = vmul.f32 0.5, %v2042_v23 }
  0xb4   : > { %563 = vrot.lane.b32.xlu0 %v2129_v40, %s1797_s26 }
  0xb7   : > { %493 = vrot.lane.b32.xlu1 %v374_v43, %s1798_s30 }
  0xb8   : > { %471 = vrot.lane.b32.xlu0 %v363_v42, %s1798_s30 }
  0xbb   : > { %571 = vrot.lane.b32.xlu1 %v2142_v45, %s1797_s26 }
  0xbc   : > { %475 = vrot.lane.b32.xlu0 %v365_v44, %s1798_s30 }
  0xc0   : > { %491 = vrot.lane.b32.xlu0 %v373_v46, %s1798_s30 }
  0xc4   : > { %569 = vrot.lane.b32.xlu0 %v2150_v47, %s1797_s26 }
  0xcd   : > { %v326_v48 = vpop.permute.xlu1 %325 }
  0xce   : > { %v322_v49 = vpop.permute.xlu0 %321  ;;  %v356_v53 = vsub.f32 %v1995_v6, %v326_v48  ;;  %v542_v48 = vmul.f32 0.5, %v2054_v28 }
  0xcf   : > { %v354_v50 = vsub.f32 %v1998_v7, %v322_v49 }
  0xd1   : > { %429 = vrot.lane.b32.xlu1 %v354_v50, %s1797_s26  ;;  %v612_v51 = vpop.permute.xlu1 %611 }
  0xd2   : > { %v324_v52 = vpop.permute.xlu0 %323  ;;  %v644_v16 = vadd.f32 %v612_v51, %v1998_v7 }
  0xd3   : > { %v355_v54 = vsub.f32 %v2005_v8, %v324_v52 }
  0xd4   : > { %v656_v24 = vmul.f32 0.5, %v644_v16 }
  0xd5   : > { %431 = vrot.lane.b32.xlu0 %v355_v54, %s1797_s26  ;;  %433 = vrot.lane.b32.xlu1 %v356_v53, %s1797_s26  ;;  %v328_v55 = vpop.permute.xlu1 %327 }
  0xd6   : > { %v614_v56 = vpop.permute.xlu0 %613  ;;  %v357_v57 = vsub.f32 %v2014_v12, %v328_v55 }
  0xd7   : > { %v645_v17 = vadd.f32 %v614_v56, %v2005_v8 }
  0xd9   : > { %435 = vrot.lane.b32.xlu1 %v357_v57, %s1797_s26  ;;  %v332_v58 = vpop.permute.xlu1 %331  ;;  %v657_v25 = vmul.f32 0.5, %v645_v17 }
  0xda   : > { %v330_v59 = vpop.permute.xlu0 %329  ;;  %v359_v60 = vsub.f32 %v2021_v14, %v332_v58 }
  0xdb   : > { %v358_v61 = vsub.f32 %v2024_v15, %v330_v59 }
  0xdd   : > { %437 = vrot.lane.b32.xlu0 %v358_v61, %s1797_s26  ;;  %439 = vrot.lane.b32.xlu1 %v359_v60, %s1797_s26  ;;  %v620_v62 = vpop.permute.xlu1 %619 }
  0xde   : > { %v618_v63 = vpop.permute.xlu0 %617  ;;  %v648_v26 = vadd.f32 %v620_v62, %v2024_v15 }
  0xdf   : > { %v647_v29 = vadd.f32 %v618_v63, %v2014_v12 }
  0xe0   : > { %v660_v34 = vmul.f32 0.5, %v648_v26 }
  0xe1   : > { %v318_v1 = vpop.permute.xlu1 %317  ;;  %v659_v35 = vmul.f32 0.5, %v647_v29 }
  0xe2   : > { %v316_v0 = vpop.permute.xlu0 %315  ;;  %v352_v3 = vsub.f32 %v2042_v23, %v318_v1 }
  0xe3   : > { %v351_v2 = vsub.f32 %v2039_v22, %v316_v0  ;;  %v538_v0 = vmul.f32 0.5, %v1995_v6 }
  0xe4   : > { %425 = vrot.lane.b32.xlu0 %v352_v3, %s1797_s26 }
  0xe5   : > { %423 = vrot.lane.b32.xlu1 %v351_v2, %s1797_s26  ;;  %v334_v5 = vpop.permute.xlu1 %333 }
  0xe6   : > { %v320_v4 = vpop.permute.xlu0 %319  ;;  %v360_v10 = vsub.f32 %v2054_v28, %v334_v5  ;;  %v541_v5 = vmul.f32 0.5, %v2021_v14 }
  0xe7   : > { %v353_v9 = vsub.f32 %v2051_v27, %v320_v4 }
  0xe8   : > { %441 = vrot.lane.b32.xlu0 %v360_v10, %s1797_s26 }
  0xe9   : > { %427 = vrot.lane.b32.xlu1 %v353_v9, %s1797_s26  ;;  %v338_v13 = vpop.permute.xlu1 %337 }
  0xea   : > { %v336_v11 = vpop.permute.xlu0 %335  ;;  %v362_v19 = vsub.f32 %v2064_v31, %v338_v13  ;;  %v535_v13 = vmul.f32 0.5, %v2051_v27 }
  0xeb   : > { %v361_v18 = vsub.f32 %v2061_v30, %v336_v11 }
  0xec   : > { %445 = vrot.lane.b32.xlu0 %v362_v19, %s1797_s26  ;;  %v544_v19 = vmul.f32 0.5, %v2064_v31 }
  0xed   : > { %443 = vrot.lane.b32.xlu1 %v361_v18, %s1797_s26  ;;  %v608_v21 = vpop.permute.xlu1 %607 }
  0xee   : > { %v606_v20 = vpop.permute.xlu0 %605  ;;  %v642_v46 = vadd.f32 %v608_v21, %v2042_v23 }
  0xef   : > { %v641_v44 = vadd.f32 %v606_v20, %v2039_v22 }
  0xf0   : > { %683 = vrot.lane.b32.xlu0 %v656_v24, %s1798_s30  ;;  %v654_v52 = vmul.f32 0.5, %v642_v46 }
  0xf1   : > { %685 = vrot.lane.b32.xlu1 %v657_v25, %s1798_s30  ;;  %v626_v33 = vpop.permute.xlu1 %625  ;;  %v653_v50 = vmul.f32 0.5, %v641_v44 }
  0xf2   : > { %v624_v32 = vpop.permute.xlu0 %623  ;;  %v651_v53 = vadd.f32 %v626_v33, %v2061_v30 }
  0xf3   : > { %v650_v51 = vadd.f32 %v624_v32, %v2054_v28 }
  0xf4   : > { %689 = vrot.lane.b32.xlu0 %v659_v35, %s1798_s30  ;;  %v663_v57 = vmul.f32 0.5, %v651_v53 }
  0xf5   : > { %691 = vrot.lane.b32.xlu1 %v660_v34, %s1798_s30  ;;  %v622_v38 = vpop.permute.xlu1 %621  ;;  %v662_v56 = vmul.f32 0.5, %v650_v51 }
  0xf6   : > { %v616_v36 = vpop.permute.xlu0 %615 }
  0xf7   : > { %v646_v60 = vadd.f32 %v616_v36, %v1995_v6 }
  0xf8   : > { %731 = vrot.lane.b32.xlu0 %v2129_v40, %s1798_s30  ;;  %v543_v40 = vmul.f32 0.5, %v2061_v30 }
  0xf9   : > { %733 = vrot.lane.b32.xlu1 %v2119_v37, %s1798_s30  ;;  %v628_v43 = vpop.permute.xlu1 %627  ;;  %v658_v63 = vmul.f32 0.5, %v646_v60 }
  0xfa   : > { %v610_v42 = vpop.permute.xlu0 %609  ;;  %v652_v21 = vadd.f32 %v628_v43, %v2064_v31 }
  0xfb   : > { %v643_v17 = vadd.f32 %v610_v42, %v2051_v27  ;;  %v1799_v42 = vmov 0.0  }
  0xfc   : > { %557 = vrot.lane.b32.xlu0 %v533_v39, %s1797_s26  ;;  %v664_v26 = vmul.f32 0.5, %v652_v21  ;;  %251 = vst.msk [vmem:[#allocation3 + $0x1] sm:$0x1] %vm245_vm1, %v1799_v42  ;;  %246 = vst.msk [vmem:[#allocation2] sm:$0x1] %vm245_vm1, %v1799_v42 }
  0xfd   : > { %559 = vrot.lane.b32.xlu1 %v534_v41, %s1797_s26  ;;  %v2200_v37 = vpop.permute.xlu1 %383  ;;  %v655_v20 = vmul.f32 0.5, %v643_v17  ;;  %247 = vst.msk [vmem:[#allocation2 + $0x1] sm:$0x1] %vm245_vm1, %v1799_v42  ;;  %248 = vst.msk [vmem:[#allocation2 + $0x2] sm:$0x1] %vm245_vm1, %v1799_v42 }
  0xfe   : > { %v2198_v49 = vpop.permute.xlu0 %381  ;;  %249 = vst.msk [vmem:[#allocation2 + $0x3] sm:$0x1] %vm245_vm1, %v1799_v42  ;;  %250 = vst.msk [vmem:[#allocation3] sm:$0x1] %vm245_vm1, %v1799_v42 }
  0xff   : > { %252 = vst.msk [vmem:[#allocation3 + $0x2] sm:$0x1] %vm245_vm1, %v1799_v42  ;;  %253 = vst.msk [vmem:[#allocation3 + $0x3] sm:$0x1] %vm245_vm1, %v1799_v42 }
 0x100   : > { %575 = vrot.lane.b32.xlu0 %v542_v48, %s1797_s26 }
 0x101   : > { %577 = vrot.lane.b32.xlu1 %v543_v40, %s1797_s26  ;;  %v2208_v55 = vpop.permute.xlu1 %389 }
 0x102   : > { %v2206_v54 = vpop.permute.xlu0 %385 }
 0x104   : > { %677 = vrot.lane.b32.xlu0 %v653_v50, %s1798_s30 }
 0x105   : > { %679 = vrot.lane.b32.xlu1 %v654_v52, %s1798_s30  ;;  %v2214_v59 = vpop.permute.xlu1 %479 }
 0x106   : > { %v2212_v58 = vpop.permute.xlu0 %387 }
 0x108   : > { %695 = vrot.lane.b32.xlu0 %v662_v56, %s1798_s30 }
 0x109   : > { %697 = vrot.lane.b32.xlu1 %v663_v57, %s1798_s30  ;;  %v2221_v62 = vpop.permute.xlu1 %375 }
 0x10a   : > { %v2219_v61 = vpop.permute.xlu0 %391 }
 0x10c   : > { %737 = vrot.lane.b32.xlu0 %v2150_v47, %s1798_s30 }
 0x10d   : > { %739 = vrot.lane.b32.xlu1 %v2142_v45, %s1798_s30  ;;  %v2228_v2 = vpop.permute.xlu1 %379  ;;  %v649_v45 = vadd.f32 %v622_v38, %v2021_v14 }
 0x10e   : > { %v478_v1 = vpop.permute.xlu0 %477 }
 0x10f   : > { %v661_v11 = vmul.f32 0.5, %v649_v45 }
 0x110   : > { %567 = vrot.lane.b32.xlu0 %v538_v0, %s1797_s26 }
 0x111   : > { %687 = vrot.lane.b32.xlu1 %v658_v63, %s1798_s30  ;;  %v2234_v4 = vpop.permute.xlu1 %395 }
 0x112   : > { %v2232_v3 = vpop.permute.xlu0 %481 }
 0x114   : > { %725 = vrot.lane.b32.xlu0 %v533_v39, %s1798_s30 }
 0x115   : > { %727 = vrot.lane.b32.xlu1 %v534_v41, %s1798_s30  ;;  %v2244_v9 = vpop.permute.xlu1 %483 }
 0x116   : > { %v2238_v47 = vpop.permute.xlu0 %377 }
 0x118   : > { %743 = vrot.lane.b32.xlu0 %v542_v48, %s1798_s30 }
 0x119   : > { %745 = vrot.lane.b32.xlu1 %v543_v40, %s1798_s30  ;;  %v2254_v18 = vpop.permute.xlu1 %487 }
 0x11a   : > { %v2246_v10 = vpop.permute.xlu0 %393 }
 0x11c   : > { %573 = vrot.lane.b32.xlu0 %v541_v5, %s1797_s26 }
 0x11d   : > { %693 = vrot.lane.b32.xlu1 %v661_v11, %s1798_s30  ;;  %v2262_v25 = vpop.permute.xlu1 %565 }
 0x11e   : > { %v2251_v16 = vpop.permute.xlu0 %397 }
 0x120   : > { %735 = vrot.lane.b32.xlu0 %v538_v0, %s1798_s30 }
 0x121   : > { %561 = vrot.lane.b32.xlu1 %v535_v13, %s1797_s26  ;;  %v2268_v32 = vpop.permute.xlu1 %473 }
 0x122   : > { %v486_v24 = vpop.permute.xlu0 %485 }
 0x124   : > { %579 = vrot.lane.b32.xlu0 %v544_v19, %s1797_s26 }
 0x125   : > { %681 = vrot.lane.b32.xlu1 %v655_v20, %s1798_s30  ;;  %v2274_v34 = vpop.permute.xlu1 %489 }
 0x126   : > { %v2266_v29 = vpop.permute.xlu0 %563 }
 0x128   : > { %699 = vrot.lane.b32.xlu0 %v664_v26, %s1798_s30 }
 0x129   : > { %741 = vrot.lane.b32.xlu1 %v541_v5, %s1798_s30  ;;  %v2278_v36 = vpop.permute.xlu1 %493 }
 0x12a   : > { %v2272_v33 = vpop.permute.xlu0 %471 }
 0x12c   : > { %729 = vrot.lane.b32.xlu0 %v535_v13, %s1798_s30 }
 0x12d   : > { %747 = vrot.lane.b32.xlu1 %v544_v19, %s1798_s30  ;;  %v2282_v39 = vpop.permute.xlu1 %571 }
 0x12e   : > { %v2276_v35 = vpop.permute.xlu0 %475 }
 0x132   : > { %v2280_v38 = vpop.permute.xlu0 %491 }
 0x136   : > { %v2284_v41 = vpop.permute.xlu0 %569 }
 0x143   : > { %v430_v43 = vpop.permute.xlu1 %429 }
 0x144   : > { %v511_v44 = vsel %vm507_vm2, %v2198_v49, %v430_v43 }
 0x145   : > { %v524_v46 = vsel %vm520_vm3, %v511_v44, %v478_v1 }
 0x146   : > { %v815_v56 = vrot.slane %v524_v46, 2 }
 0x147   : > { %v432_v48 = vpop.permute.xlu0 %431  ;;  %v434_v40 = vpop.permute.xlu1 %433 }
 0x148   : > { %v512_v50 = vsel %vm507_vm2, %v2200_v37, %v432_v48  ;;  %v513_v51 = vsel %vm507_vm2, %v2206_v54, %v434_v40 }
 0x149   : > { %v525_v52 = vsel %vm520_vm3, %v512_v50, %v2214_v59  ;;  %v526_v53 = vsel %vm520_vm3, %v513_v51, %v2232_v3 }
 0x14a   : > { %v816_v57 = vrot.slane %v525_v52, 2  ;;  %v818_v49 = vrot.slane %v526_v53, 2 }
 0x14b   : > { %v436_v60 = vpop.permute.xlu1 %435 }
 0x14c   : > { %v817_v63 = vsel %vm809_vm4, %v815_v56, %v816_v57  ;;  %v819_v0 = vsel %vm809_vm4, %v816_v57, %v818_v49  ;;  %v514_v37 = vsel %vm507_vm2, %v2212_v58, %v436_v60 }
 0x14d   : > { %v840_v1 = vadd.f32 %v817_v63, %v524_v46  ;;  %v841_v54 = vadd.f32 %v819_v0, %v525_v52  ;;  %v527_v45 = vsel %vm520_vm3, %v514_v37, %v2244_v9 }
 0x14e   : > { %v820_v26 = vrot.slane %v527_v45, 2 }
 0x14f   : > { %v848_v59 = vmul.f32 0.5, %v840_v1  ;;  %v849_v5 = vmul.f32 0.5, %v841_v54  ;;  %v438_v11 = vpop.permute.xlu0 %437  ;;  %v440_v3 = vpop.permute.xlu1 %439 }
 0x150   : > { %v515_v13 = vsel %vm507_vm2, %v2208_v55, %v438_v11  ;;  %v516_v17 = vsel %vm507_vm2, %v2219_v61, %v440_v3 }
 0x151   : > { %v865_v19 = vrot.slane %v848_v59, 7  ;;  %v866_v20 = vrot.slane %v849_v5, 7  ;;  %v528_v21 = vsel %vm520_vm3, %v515_v13, %v486_v24  ;;  %v529_v58 = vsel %vm520_vm3, %v516_v17, %v2254_v18 }
 0x152   : > { %v821_v42 = vrot.slane %v528_v21, 2  ;;  %v823_v9 = vrot.slane %v529_v58, 2 }
 0x153   : > { %v2318_v43 = vadd.f32 %v865_v19, %v524_v46  ;;  %v867_v44 = vsel %vm274_vm0, %v865_v19, %v866_v20  ;;  %v2321_v48 = vadd.f32 %v866_v20, %v526_v53 }
 0x154   : > { %v2323_v55 = vadd.f32 %v867_v44, %v525_v52  ;;  %v822_v61 = vsel %vm809_vm4, %v820_v26, %v821_v42  ;;  %v824_v40 = vsel %vm809_vm4, %v821_v42, %v823_v9 }
 0x155   : > { %v842_v50 = vadd.f32 %v822_v61, %v527_v45  ;;  %v843_v24 = vadd.f32 %v824_v40, %v528_v21 }
 0x156   : > { %v426_v18 = vpop.permute.xlu0 %425 }
 0x157   : > { %v850_v51 = vmul.f32 0.5, %v842_v50  ;;  %v851_v56 = vmul.f32 0.5, %v843_v24  ;;  %v424_v57 = vpop.permute.xlu1 %423  ;;  %v509_v46 = vsel %vm507_vm2, %v2238_v47, %v426_v18 }
 0x158   : > { %v508_v49 = vsel %vm507_vm2, %v2221_v62, %v424_v57  ;;  %v522_v52 = vsel %vm520_vm3, %v509_v46, %v2268_v32 }
 0x159   : > { %v868_v53 = vrot.slane %v850_v51, 7  ;;  %v869_v60 = vrot.slane %v851_v56, 7  ;;  %v521_v63 = vsel %vm520_vm3, %v508_v49, %v2272_v33  ;;  %v811_v0 = vrot.slane %v522_v52, 2 }
 0x15a   : > { %v810_v37 = vrot.slane %v521_v63, 2  ;;  %v442_v47 = vpop.permute.xlu0 %441 }
 0x15b   : > { %v2335_v1 = vadd.f32 %v868_v53, %v527_v45  ;;  %v870_v54 = vsel %vm274_vm0, %v868_v53, %v869_v60  ;;  %v2338_v59 = vadd.f32 %v869_v60, %v529_v58  ;;  %v428_v5 = vpop.permute.xlu1 %427  ;;  %v517_v32 = vsel %vm507_vm2, %v2246_v10, %v442_v47 }
 0x15c   : > { %v2340_v11 = vadd.f32 %v870_v54, %v528_v21  ;;  %v812_v62 = vsel %vm809_vm4, %v810_v37, %v811_v0  ;;  %v510_v33 = vsel %vm507_vm2, %v2228_v2, %v428_v5  ;;  %v530_v45 = vsel %vm520_vm3, %v517_v32, %v2274_v34 }
 0x15d   : > { %v838_v3 = vadd.f32 %v812_v62, %v521_v63  ;;  %v523_v13 = vsel %vm520_vm3, %v510_v33, %v2276_v35  ;;  %v825_v9 = vrot.slane %v530_v45, 2  ;;  %v597_v5 = vadd.f32 %v2262_v25, %v2005_v8 }
 0x15e   : > { %v813_v17 = vrot.slane %v523_v13, 2  ;;  %v446_v20 = vpop.permute.xlu0 %445  ;;  %v596_v62 = vadd.f32 %v2266_v29, %v1998_v7 }
 0x15f   : > { %v846_v19 = vmul.f32 0.5, %v838_v3  ;;  %v444_v21 = vpop.permute.xlu1 %443  ;;  %v519_v26 = vsel %vm507_vm2, %v2251_v16, %v446_v20 }
 0x160   : > { %v814_v58 = vsel %vm809_vm4, %v811_v0, %v813_v17  ;;  %v518_v10 = vsel %vm507_vm2, %v2234_v4, %v444_v21  ;;  %v532_v34 = vsel %vm520_vm3, %v519_v26, %v2278_v36 }
 0x161   : > { %v862_v2 = vrot.slane %v846_v19, 7  ;;  %v839_v42 = vadd.f32 %v814_v58, %v522_v52  ;;  %v531_v35 = vsel %vm520_vm3, %v518_v10, %v2280_v38  ;;  %v828_v44 = vrot.slane %v532_v34, 2 }
 0x162   : > { %v826_v61 = vrot.slane %v531_v35, 2  ;;  %v684_v24 = vpop.permute.xlu0 %683 }
 0x163   : > { %v2360_v40 = vadd.f32 %v862_v2, %v521_v63  ;;  %v847_v50 = vmul.f32 0.5, %v839_v42  ;;  %v686_v51 = vpop.permute.xlu1 %685  ;;  %v716_v54 = vadd.f32 %v684_v24, %v1998_v7  ;;  %v946_v24 = vmul.f32 %v2318_v43, %v2318_v43 }
 0x164   : > { %v827_v16 = vsel %vm809_vm4, %v825_v9, %v826_v61  ;;  %v829_v4 = vsel %vm809_vm4, %v826_v61, %v828_v44  ;;  %v717_v47 = vadd.f32 %v686_v51, %v2005_v8  ;;  %v599_v43 = vadd.f32 %v2284_v41, %v2014_v12 }
 0x165   : > { %v863_v56 = vrot.slane %v847_v50, 7  ;;  %v844_v18 = vadd.f32 %v827_v16, %v530_v45  ;;  %v845_v57 = vadd.f32 %v829_v4, %v531_v35  ;;  %v776_v21 = vsel %vm507_vm2, %v596_v62, %v716_v54 }
 0x166   : > { %v690_v53 = vpop.permute.xlu0 %689  ;;  %v777_v25 = vsel %vm507_vm2, %v597_v5, %v717_v47 }
 0x167   : > { %v864_v36 = vsel %vm274_vm0, %v862_v2, %v863_v56  ;;  %v2365_v46 = vadd.f32 %v863_v56, %v523_v13  ;;  %v852_v38 = vmul.f32 0.5, %v844_v18  ;;  %v853_v49 = vmul.f32 0.5, %v845_v57  ;;  %v692_v60 = vpop.permute.xlu1 %691 }
 0x168   : > { %v2367_v63 = vadd.f32 %v864_v36, %v522_v52  ;;  %v719_v36 = vadd.f32 %v690_v53, %v2014_v12 }
 0x169   : > { %v871_v0 = vrot.slane %v852_v38, 7  ;;  %v872_v37 = vrot.slane %v853_v49, 7  ;;  %v720_v38 = vadd.f32 %v692_v60, %v2024_v15  ;;  %v600_v49 = vadd.f32 %v2282_v39, %v2024_v15 }
 0x16a   : > { %v732_v52 = vpop.permute.xlu0 %731  ;;  %v779_v5 = vsel %vm507_vm2, %v599_v43, %v719_v36 }
 0x16b   : > { %v873_v32 = vsel %vm274_vm0, %v871_v0, %v872_v37  ;;  %v2376_v33 = vadd.f32 %v871_v0, %v530_v45  ;;  %v2378_v3 = vadd.f32 %v872_v37, %v532_v34  ;;  %v734_v13 = vpop.permute.xlu1 %733  ;;  %v764_v19 = vadd.f32 %v732_v52, %v1998_v7 }
 0x16c   : > { %v2380_v17 = vadd.f32 %v873_v32, %v531_v35  ;;  %v765_v20 = vadd.f32 %v734_v13, %v2005_v8  ;;  %v780_v62 = vsel %vm507_vm2, %v600_v49, %v720_v38 }
 0x16d   : > { %v788_v29 = vsel %vm520_vm3, %v776_v21, %v764_v19 }
 0x16e   : > { %v2388_v45 = vsel %vm520_vm3, %v777_v25, %v765_v20  ;;  %v910_v58 = vrot.slane %v788_v29, 6  ;;  %v558_v10 = vpop.permute.xlu0 %557 }
 0x16f   : > { %v911_v26 = vrot.slane %v2388_v45, 6  ;;  %v560_v2 = vpop.permute.xlu1 %559  ;;  %v593_v21 = vadd.f32 %v558_v10, %v2039_v22 }
 0x170   : > { %v934_v42 = vsub.f32 %v788_v29, %v910_v58  ;;  %v594_v25 = vadd.f32 %v560_v2, %v2042_v23 }
 0x171   : > { %v912_v7 = vsel %vm906_vm5, %v910_v58, %v911_v26 }
 0x172   : > { %v935_v8 = vsub.f32 %v2388_v45, %v912_v7  ;;  %v958_v34 = vmul.f32 %v934_v42, %v934_v42  ;;  %v576_v35 = vpop.permute.xlu0 %575 }
 0x173   : > { %v578_v9 = vpop.permute.xlu1 %577  ;;  %v602_v2 = vadd.f32 %v576_v35, %v2054_v28 }
 0x174   : > { %v2395_v44 = vmul.f32 %v935_v8, %v935_v8  ;;  %v985_v61 = vrot.slane %v958_v34, 1 }
 0x176   : > { %v986_v50 = vrot.slane %v2395_v44, 1  ;;  %v678_v51 = vpop.permute.xlu0 %677 }
 0x177   : > { %v680_v16 = vpop.permute.xlu1 %679  ;;  %v713_v13 = vadd.f32 %v678_v51, %v2039_v22 }
 0x178   : > { %v987_v4 = vsel %vm979_vm6, %v985_v61, %v986_v50 }
 0x179   : > { %v2403_v56 = vadd.f32 %v987_v4, %v946_v24  ;;  %v773_v24 = vsel %vm507_vm2, %v593_v21, %v713_v13 }
 0x17a   : > { %v696_v18 = vpop.permute.xlu0 %695 }
 0x17b   : > { %v698_v57 = vpop.permute.xlu1 %697  ;;  %1609 = vrsqrt.f32 %v2403_v56  ;;  %v722_v7 = vadd.f32 %v696_v18, %v2054_v28  ;;  %vm1047_vm7 = vcmp.eq.f32.partialorder %v2403_v56, inf  ;;  %vm1049_vm8 = vcmp.eq.f32.partialorder %v2403_v56, 0.0 }
 0x17e   : > { %v738_v0 = vpop.permute.xlu0 %737 }
 0x17f   : > { %v740_v37 = vpop.permute.xlu1 %739  ;;  %v767_v54 = vadd.f32 %v738_v0, %v2014_v12  ;;  %v714_v12 = vadd.f32 %v680_v16, %v2042_v23  ;;  %v723_v16 = vadd.f32 %v698_v57, %v2061_v30  ;;  %v782_v0 = vsel %vm507_vm2, %v602_v2, %v722_v7 }
 0x180   : > { %v768_v47 = vadd.f32 %v740_v37, %v2024_v15  ;;  %v948_v2 = vmul.f32 %v2321_v48, %v2321_v48  ;;  %v1050_v48 = vand.u32 2147483648, %v2403_v56 }
 0x181   : > { %v791_v53 = vsel %vm520_vm3, %v779_v5, %v767_v54  ;;  %v774_v51 = vsel %vm507_vm2, %v594_v25, %v714_v12 }
 0x182   : > { %v2417_v60 = vsel %vm520_vm3, %v780_v62, %v768_v47  ;;  %v913_v32 = vrot.slane %v791_v53, 6  ;;  %v568_v52 = vpop.permute.xlu0 %567 }
 0x183   : > { %v914_v39 = vrot.slane %v2417_v60, 6  ;;  %v688_v41 = vpop.permute.xlu1 %687 }
 0x184   : > { %v937_v15 = vsub.f32 %v791_v53, %v913_v32  ;;  %v718_v21 = vadd.f32 %v688_v41, %v1995_v6 }
 0x185   : > { %v915_v19 = vsel %vm906_vm5, %v913_v32, %v914_v39  ;;  %v1610_v13 = vpop.eup %1609 }
 0x186   : > { %v938_v20 = vsub.f32 %v2417_v60, %v915_v19  ;;  %v961_v29 = vmul.f32 %v937_v15, %v937_v15  ;;  %v726_v58 = vpop.permute.xlu0 %725 }
 0x187   : > { %v728_v42 = vpop.permute.xlu1 %727  ;;  %v761_v34 = vadd.f32 %v726_v58, %v2039_v22  ;;  %v603_v22 = vadd.f32 %v578_v9, %v2061_v30 }
 0x188   : > { %v2430_v8 = vmul.f32 %v938_v20, %v938_v20  ;;  %v762_v61 = vadd.f32 %v728_v42, %v2042_v23  ;;  %v990_v10 = vrot.slane %v961_v29, 1  ;;  %v949_v23 = vmul.f32 %v2335_v1, %v2335_v1 }
 0x189   : > { %v785_v36 = vsel %vm520_vm3, %v773_v24, %v761_v34  ;;  %v783_v9 = vsel %vm507_vm2, %v603_v22, %v723_v16  ;;  %v598_v20 = vadd.f32 %v568_v52, %v1995_v6  ;;  %v1046_v29 = vmul.f32 %v1610_v13, %v2403_v56 }
 0x18a   : > { %v991_v4 = vrot.slane %v2430_v8, 1  ;;  %v2441_v18 = vsel %vm520_vm3, %v774_v51, %v762_v61  ;;  %v907_v38 = vrot.slane %v785_v36, 6  ;;  %v744_v43 = vpop.permute.xlu0 %743  ;;  %v943_v34 = vmul.f32 %v2360_v40, %v2360_v40 }
 0x18b   : > { %v908_v49 = vrot.slane %v2441_v18, 6  ;;  %v746_v57 = vpop.permute.xlu1 %745  ;;  %v770_v37 = vadd.f32 %v744_v43, %v2054_v28  ;;  %v778_v40 = vsel %vm507_vm2, %v598_v20, %v718_v21  ;;  %v1048_v22 = vsel %vm1047_vm7, %v2403_v56, %v1046_v29 }
 0x18c   : > { %v992_v35 = vsel %vm979_vm6, %v990_v10, %v991_v4  ;;  %v771_v54 = vadd.f32 %v746_v57, %v2061_v30  ;;  %v931_v1 = vsub.f32 %v785_v36, %v907_v38  ;;  %v947_v57 = vmul.f32 %v2323_v55, %v2323_v55 }
 0x18d   : > { %v2454_v47 = vadd.f32 %v992_v35, %v949_v23  ;;  %v909_v5 = vsel %vm906_vm5, %v907_v38, %v908_v49  ;;  %v794_v53 = vsel %vm520_vm3, %v782_v0, %v770_v37  ;;  %v2502_v37 = vmul.f32 %v2340_v11, %v2340_v11 }
 0x18e   : > { %v932_v62 = vsub.f32 %v2441_v18, %v909_v5  ;;  %v2462_v32 = vsel %vm520_vm3, %v783_v9, %v771_v54  ;;  %v574_v28 = vpop.permute.xlu0 %573  ;;  %v955_v12 = vmul.f32 %v931_v1, %v931_v1  ;;  %v916_v19 = vrot.slane %v794_v53, 6 }
 0x18f   : > { %1611 = vrsqrt.f32 %v2454_v47  ;;  %v694_v30 = vpop.permute.xlu1 %693  ;;  %v917_v25 = vrot.slane %v2462_v32, 6  ;;  %v2510_v1 = vsel %vm1049_vm8, %v1050_v48, %v1048_v22  ;;  %v601_v5 = vadd.f32 %v574_v28, %v2021_v14 }
 0x190   : > { %v2465_v15 = vmul.f32 %v932_v62, %v932_v62  ;;  %v980_v58 = vrot.slane %v955_v12, 1  ;;  %v940_v7 = vsub.f32 %v794_v53, %v916_v19  ;;  %v721_v62 = vadd.f32 %v694_v30, %v2021_v14 }
 0x191   : > { %v918_v61 = vsel %vm906_vm5, %v916_v19, %v917_v25  ;;  %v2516_v11 = vmul.f32 %v2365_v46, %v2365_v46  ;;  %v2528_v13 = vmul.f32 %v2380_v17, %v2380_v17  ;;  %v2532_v28 = vmul.f32 %v2378_v3, %v2378_v3 }
 0x192   : > { %v981_v42 = vrot.slane %v2465_v15, 1  ;;  %v736_v24 = vpop.permute.xlu0 %735  ;;  %v964_v41 = vmul.f32 %v940_v7, %v940_v7  ;;  %v941_v16 = vsub.f32 %v2462_v32, %v918_v61  ;;  %v1129_v19 = vrot.slane %v2510_v1, 1 }
 0x193   : > { %v562_v51 = vpop.permute.xlu1 %561  ;;  %v766_v10 = vadd.f32 %v736_v24, %v1995_v6  ;;  %v2496_v6 = vmul.f32 %v2338_v59, %v2338_v59  ;;  %v952_v59 = vmul.f32 %v2376_v33, %v2376_v33  ;;  %v2524_v33 = vmul.f32 %v2367_v63, %v2367_v63 }
 0x194   : > { %v982_v52 = vsel %vm979_vm6, %v980_v58, %v981_v42  ;;  %v995_v23 = vrot.slane %v964_v41, 1  ;;  %v2489_v38 = vmul.f32 %v941_v16, %v941_v16  ;;  %v1219_v20 = vrot.slane %v2403_v56, 1 }
 0x195   : > { %v2486_v36 = vadd.f32 %v982_v52, %v943_v34  ;;  %v790_v43 = vsel %vm520_vm3, %v778_v40, %v766_v10  ;;  %vm1068_vm10 = vcmp.eq.f32.partialorder %v2454_v47, inf  ;;  %vm1070_vm11 = vcmp.eq.f32.partialorder %v2454_v47, 0.0 }
 0x196   : > { %v580_v0 = vpop.permute.xlu0 %579  ;;  %v996_v54 = vrot.slane %v2489_v38, 1  ;;  %v936_v55 = vsub.f32 %v790_v43, %v911_v26  ;;  %v1071_v17 = vand.u32 2147483648, %v2454_v47  ;;  %v781_v3 = vsel %vm507_vm2, %v601_v5, %v721_v62 }
 0x197   : > { %1613 = vrsqrt.f32 %v2486_v36  ;;  %v682_v35 = vpop.permute.xlu1 %681  ;;  %v595_v56 = vadd.f32 %v562_v51, %v2051_v27  ;;  %v1224_v52 = vrot.slane %v2454_v47, 1  ;;  %vm1026_vm12 = vcmp.eq.f32.partialorder %v2486_v36, inf }
 0x198   : > { %v997_v45 = vsel %vm979_vm6, %v995_v23, %v996_v54  ;;  %v960_v26 = vmul.f32 %v936_v55, %v936_v55  ;;  %v715_v34 = vadd.f32 %v682_v35, %v2051_v27  ;;  %vm1028_vm13 = vcmp.eq.f32.partialorder %v2486_v36, 0.0 }
 0x199   : > { %v1612_v9 = vpop.eup %1611  ;;  %v2534_v46 = vadd.f32 %v997_v45, %v952_v59  ;;  %v1029_v16 = vand.u32 2147483648, %v2486_v36  ;;  %v604_v60 = vadd.f32 %v580_v0, %v2064_v31 }
 0x19a   : > { %v1067_v53 = vmul.f32 %v1612_v9, %v2454_v47  ;;  %v700_v30 = vpop.permute.xlu0 %699  ;;  %v988_v21 = vrot.slane %v960_v26, 1  ;;  %v775_v22 = vsel %vm507_vm2, %v595_v56, %v715_v34 }
 0x19b   : > { %v742_v12 = vpop.permute.xlu1 %741  ;;  %1615 = vrsqrt.f32 %v2534_v46  ;;  %v724_v48 = vadd.f32 %v700_v30, %v2064_v31  ;;  %vm1089_vm14 = vcmp.eq.f32.partialorder %v2534_v46, inf  ;;  %v1229_v26 = vrot.slane %v2534_v46, 1 }
 0x19c   : > { %v769_v63 = vadd.f32 %v742_v12, %v2021_v14  ;;  %v1069_v29 = vsel %vm1068_vm10, %v2454_v47, %v1067_v53  ;;  %v989_v58 = vsel %vm979_vm6, %v986_v50, %v988_v21  ;;  %v2551_v14 = vadd.f32 %v988_v21, %v948_v2 }
 0x19d   : > { %v2549_v7 = vadd.f32 %v989_v58, %v947_v57  ;;  %v2562_v51 = vsel %vm1070_vm11, %v1071_v17, %v1069_v29  ;;  %v1214_v2 = vrot.slane %v2486_v36, 1  ;;  %v1092_v57 = vand.u32 2147483648, %v2534_v46 }
 0x19e   : > { %v793_v61 = vsel %vm520_vm3, %v781_v3, %v769_v63  ;;  %v730_v24 = vpop.permute.xlu0 %729  ;;  %v1222_v40 = vrot.slane %v2551_v14, 1  ;;  %v1134_v43 = vrot.slane %v2562_v51, 1  ;;  %v784_v21 = vsel %vm507_vm2, %v604_v60, %v724_v48 }
 0x19f   : > { %v939_v44 = vsub.f32 %v793_v61, %v914_v39  ;;  %v763_v50 = vadd.f32 %v730_v24, %v2051_v27  ;;  %1617 = vrsqrt.f32 %v2549_v7  ;;  %v748_v27 = vpop.permute.xlu1 %747  ;;  %v1220_v39 = vrot.slane %v2549_v7, 1 }
 0x1a0   : > { %1619 = vrsqrt.f32 %v2551_v14  ;;  %v772_v59 = vadd.f32 %v748_v27, %v2064_v31  ;;  %vm1054_vm15 = vcmp.eq.f32.partialorder %v2549_v7, inf  ;;  %vm1056_vm0 = vcmp.eq.f32.partialorder %v2549_v7, 0.0 }
 0x1a1   : > { %v1614_v41 = vpop.eup %1613  ;;  %v963_v23 = vmul.f32 %v939_v44, %v939_v44  ;;  %v787_v35 = vsel %vm520_vm3, %v775_v22, %v763_v50  ;;  %v1221_v55 = vsel %vm979_vm6, %v1219_v20, %v1220_v39  ;;  %v1223_v0 = vsel %vm979_vm6, %v1220_v39, %v1222_v40 }
 0x1a2   : > { %v1025_v10 = vmul.f32 %v1614_v41, %v2486_v36  ;;  %v1251_v62 = vsel %vm1152_vm9, %v1221_v55, 0.0  ;;  %v1252_v53 = vsel %vm1152_vm9, %v1223_v0, 0.0  ;;  %v933_v45 = vsub.f32 %v787_v35, %v908_v49 }
 0x1a3   : > { %v993_v9 = vrot.slane %v963_v23, 1  ;;  %v1253_v30 = vadd.f32 %v1252_v53, %v1251_v62  ;;  %vm1061_vm4 = vcmp.eq.f32.partialorder %v2551_v14, inf  ;;  %v796_v63 = vsel %vm520_vm3, %v784_v21, %v772_v59 }
 0x1a4   : > { %v1027_v5 = vsel %vm1026_vm12, %v2486_v36, %v1025_v10  ;;  %vm1091_vm2 = vcmp.eq.f32.partialorder %v2534_v46, 0.0  ;;  %vm1063_vm5 = vcmp.eq.f32.partialorder %v2551_v14, 0.0  ;;  %v1064_v3 = vand.u32 2147483648, %v2551_v14 }
 0x1a5   : > { %v994_v31 = vsel %vm979_vm6, %v991_v4, %v993_v9  ;;  %v2594_v12 = vadd.f32 %v993_v9, %v2496_v6  ;;  %v1616_v20 = vpop.eup %1615  ;;  %v2604_v49 = vsel %vm1028_vm13, %v1029_v16, %v1027_v5  ;;  %v1254_v8 = vrot.slane %v1253_v30, 4 }
 0x1a6   : > { %v2600_v18 = vadd.f32 %v994_v31, %v2502_v37  ;;  %v957_v4 = vmul.f32 %v933_v45, %v933_v45  ;;  %v1057_v6 = vand.u32 2147483648, %v2549_v7  ;;  %v1088_v37 = vmul.f32 %v1616_v20, %v2534_v46 }
 0x1a7   : > { %1621 = vrsqrt.f32 %v2594_v12  ;;  %v1255_v29 = vadd.f32 %v1254_v8, %v1253_v30  ;;  %v1124_v56 = vrot.slane %v2604_v49, 1  ;;  %v1227_v24 = vrot.slane %v2594_v12, 1 }
 0x1a8   : > { %1623 = vrsqrt.f32 %v2600_v18  ;;  %v1225_v61 = vrot.slane %v2600_v18, 1  ;;  %vm1082_vm3 = vcmp.eq.f32.partialorder %v2594_v12, inf  ;;  %v983_v50 = vrot.slane %v957_v4, 1 }
 0x1a9   : > { %v1618_v17 = vpop.eup %1617  ;;  %v942_v41 = vsub.f32 %v796_v63, %v917_v25  ;;  %v1256_v10 = vrot.slane %v1255_v29, 2  ;;  %vm1084_vm7 = vcmp.eq.f32.partialorder %v2594_v12, 0.0  ;;  %v1090_v39 = vsel %vm1089_vm14, %v2534_v46, %v1088_v37 }
 0x1aa   : > { %v1620_v58 = vpop.eup %1619  ;;  %v1053_v34 = vmul.f32 %v1618_v17, %v2549_v7  ;;  %v1226_v60 = vsel %vm979_vm6, %v1224_v52, %v1225_v61  ;;  %v1228_v27 = vsel %vm979_vm6, %v1225_v61, %v1227_v24  ;;  %v984_v23 = vsel %vm979_vm6, %v981_v42, %v983_v50 }
 0x1ab   : > { %v1060_v44 = vmul.f32 %v1620_v58, %v2551_v14  ;;  %v1260_v40 = vsel %vm1152_vm9, %v1226_v60, 0.0  ;;  %v1261_v52 = vsel %vm1152_vm9, %v1228_v27, 0.0  ;;  %vm1075_vm8 = vcmp.eq.f32.partialorder %v2600_v18, inf }
 0x1ac   : > { %v1055_v16 = vsel %vm1054_vm15, %v2549_v7, %v1053_v34  ;;  %v1262_v7 = vadd.f32 %v1261_v52, %v1260_v40  ;;  %v2648_v35 = vadd.f32 %v984_v23, %v2524_v33  ;;  %v2654_v0 = vadd.f32 %v983_v50, %v2516_v11  ;;  %v1199_v40 = vld [vmem:[#allocation3 + $0x1] sm:$0x1] }
 0x1ad   : > { %v1058_v32 = vsel %vm1056_vm0, %v1057_v6, %v1055_v16  ;;  %v1062_v25 = vsel %vm1061_vm4, %v2551_v14, %v1060_v44  ;;  %v1257_v14 = vadd.f32 %v1256_v10, %v1255_v29  ;;  %v966_v9 = vmul.f32 %v942_v41, %v942_v41 }
 0x1ae   : > { %v1065_v47 = vsel %vm1063_vm5, %v1064_v3, %v1062_v25  ;;  %v1130_v22 = vrot.slane %v1058_v32, 1  ;;  %v1263_v5 = vrot.slane %v1262_v7, 4  ;;  %1625 = vrsqrt.f32 %v2648_v35 }
 0x1af   : > { %v1132_v48 = vrot.slane %v1065_v47, 1  ;;  %v2663_v1 = vsel %vm1091_vm2, %v1092_v57, %v1090_v39  ;;  %vm1077_vm10 = vcmp.eq.f32.partialorder %v2600_v18, 0.0  ;;  %v1078_v45 = vand.u32 2147483648, %v2600_v18 }
 0x1b0   : > { %v1131_v55 = vsel %vm979_vm6, %v1129_v19, %v1130_v22  ;;  %v1085_v30 = vand.u32 2147483648, %v2594_v12  ;;  %v1264_v20 = vadd.f32 %v1263_v5, %v1262_v7  ;;  %1627 = vrsqrt.f32 %v2654_v0 }
 0x1b1   : > { %v1622_v59 = vpop.eup %1621  ;;  %v1133_v15 = vsel %vm979_vm6, %v1130_v22, %v1132_v48  ;;  %v1162_v42 = vsel %vm1152_vm9, %v1131_v55, 0.0  ;;  %v998_v57 = vrot.slane %v966_v9, 1  ;;  %v1258_v6 = vrot.slane %v1257_v14, 1 }
 0x1b2   : > { %v1624_v62 = vpop.eup %1623  ;;  %v1163_v33 = vsel %vm1152_vm9, %v1133_v15, 0.0  ;;  %v1081_v11 = vmul.f32 %v1622_v59, %v2594_v12  ;;  %vm1033_vm11 = vcmp.eq.f32.partialorder %v2648_v35, inf  ;;  %v1215_v37 = vrot.slane %v2648_v35, 1 }
 0x1b3   : > { %v1164_v19 = vadd.f32 %v1163_v33, %v1162_v42  ;;  %v1074_v53 = vmul.f32 %v1624_v62, %v2600_v18  ;;  %vm1035_vm12 = vcmp.eq.f32.partialorder %v2648_v35, 0.0  ;;  %v1036_v29 = vand.u32 2147483648, %v2648_v35 }
 0x1b4   : > { %v1083_v31 = vsel %vm1082_vm3, %v2594_v12, %v1081_v11  ;;  %v1217_v58 = vrot.slane %v2654_v0, 1  ;;  %v1265_v34 = vrot.slane %v1264_v20, 2  ;;  %vm1040_vm13 = vcmp.eq.f32.partialorder %v2654_v0, inf }
 0x1b5   : > { %v1165_v21 = vrot.slane %v1164_v19, 4  ;;  %v1076_v8 = vsel %vm1075_vm8, %v2600_v18, %v1074_v53  ;;  %v1086_v4 = vsel %vm1084_vm7, %v1085_v30, %v1083_v31  ;;  %v1216_v12 = vsel %vm979_vm6, %v1214_v2, %v1215_v37 }
 0x1b6   : > { %v1079_v63 = vsel %vm1077_vm10, %v1078_v45, %v1076_v8  ;;  %v1137_v17 = vrot.slane %v1086_v4, 1  ;;  %v999_v18 = vsel %vm979_vm6, %v996_v54, %v998_v57  ;;  %v2693_v61 = vadd.f32 %v998_v57, %v2532_v28 }
 0x1b7   : > { %v1135_v3 = vrot.slane %v1079_v63, 1  ;;  %v1166_v24 = vadd.f32 %v1165_v21, %v1164_v19  ;;  %v1218_v41 = vsel %vm979_vm6, %v1215_v37, %v1217_v58  ;;  %v1242_v38 = vsel %vm1152_vm9, %v1216_v12, 0.0 }
 0x1b8   : > { %v1243_v54 = vsel %vm1152_vm9, %v1218_v41, 0.0  ;;  %v1626_v16 = vpop.eup %1625  ;;  %v2705_v60 = vadd.f32 %v999_v18, %v2528_v13  ;;  %1629 = vrsqrt.f32 %v2693_v61  ;;  %vm1042_vm14 = vcmp.eq.f32.partialorder %v2654_v0, 0.0  ;;  %v1110_v41 = vld [vmem:[#allocation2 + $0x2] sm:$0x1] }
 0x1b9   : > { %v1136_v44 = vsel %vm979_vm6, %v1134_v43, %v1135_v3  ;;  %v1138_v50 = vsel %vm979_vm6, %v1135_v3, %v1137_v17  ;;  %v1244_v10 = vadd.f32 %v1243_v54, %v1242_v38  ;;  %v1032_v51 = vmul.f32 %v1626_v16, %v2648_v35 }
 0x1ba   : > { %v1171_v36 = vsel %vm1152_vm9, %v1136_v44, 0.0  ;;  %v1172_v2 = vsel %vm1152_vm9, %v1138_v50, 0.0  ;;  %v1043_v43 = vand.u32 2147483648, %v2654_v0  ;;  %v1259_v27 = vadd.f32 %v1258_v6, %v1257_v14  ;;  %v1628_v47 = vpop.eup %1627  ;;  %v1109_v50 = vld [vmem:[#allocation2 + $0x1] sm:$0x1] }
 0x1bb   : > { %v1173_v28 = vadd.f32 %v1172_v2, %v1171_v36  ;;  %v1266_v32 = vadd.f32 %v1265_v34, %v1264_v20  ;;  %v1245_v25 = vrot.slane %v1244_v10, 4  ;;  %1631 = vrsqrt.f32 %v2705_v60  ;;  %v1200_v20 = vld [vmem:[#allocation3 + $0x2] sm:$0x1] }
 0x1bc   : > { %v1167_v22 = vrot.slane %v1166_v24, 2  ;;  %v1034_v13 = vsel %vm1033_vm11, %v2648_v35, %v1032_v51  ;;  %v1106_v52 = vand.u32 2147483648, %v2693_v61  ;;  %v1230_v23 = vrot.slane %v2705_v60, 1 }
 0x1bd   : > { %v1174_v39 = vrot.slane %v1173_v28, 4  ;;  %v1037_v7 = vsel %vm1035_vm12, %v1036_v29, %v1034_v13  ;;  %v1039_v55 = vmul.f32 %v1628_v47, %v2654_v0  ;;  %v1246_v14 = vadd.f32 %v1245_v25, %v1244_v10  ;;  %v1198_v10 = vld [vmem:[#allocation3] sm:$0x1] }
 0x1be   : > { %vm1103_vm15 = vcmp.eq.f32.partialorder %v2693_v61, inf  ;;  %v1125_v9 = vrot.slane %v1037_v7, 1  ;;  %vm1105_vm0 = vcmp.eq.f32.partialorder %v2693_v61, 0.0  ;;  %v1231_v59 = vsel %vm979_vm6, %v1229_v26, %v1230_v23 }
 0x1bf   : > { %v1175_v48 = vadd.f32 %v1174_v39, %v1173_v28  ;;  %v1232_v15 = vrot.slane %v2693_v61, 1  ;;  %v1279_v42 = vadd.f32 %v1259_v27, %v1199_v40  ;;  %v1041_v35 = vsel %vm1040_vm13, %v2654_v0, %v1039_v55 }
 0x1c0   : > { %v1247_v62 = vrot.slane %v1246_v14, 2  ;;  %v1269_v33 = vsel %vm1152_vm9, %v1231_v59, 0.0  ;;  %v1044_v11 = vsel %vm1042_vm14, %v1043_v43, %v1041_v35  ;;  %v1126_v46 = vsel %vm979_vm6, %v1124_v56, %v1125_v9  ;;  %v1201_v59 = vld [vmem:[#allocation3 + $0x3] sm:$0x1] }
 0x1c1   : > { %v1176_v5 = vrot.slane %v1175_v48, 2  ;;  %v1233_v26 = vsel %vm979_vm6, %v1230_v23, %v1232_v15  ;;  %1283 = vst.msk [vmem:[#allocation3 + $0x1] sm:$0x1] %vm245_vm1, %v1279_v42  ;;  %v1267_v19 = vrot.slane %v1266_v32, 1  ;;  %v1127_v53 = vrot.slane %v1044_v11, 1 }
 0x1c2   : > { %v1153_v45 = vsel %vm1152_vm9, %v1126_v46, 0.0  ;;  %v1248_v30 = vadd.f32 %v1247_v62, %v1246_v14  ;;  %v1270_v31 = vsel %vm1152_vm9, %v1233_v26, 0.0  ;;  %v1168_v0 = vadd.f32 %v1167_v22, %v1166_v24  ;;  %v1630_v4 = vpop.eup %1629 }
 0x1c3   : > { %v1271_v57 = vadd.f32 %v1270_v31, %v1269_v33  ;;  %v1268_v21 = vadd.f32 %v1267_v19, %v1266_v32  ;;  %v1177_v8 = vadd.f32 %v1176_v5, %v1175_v48  ;;  %v1128_v49 = vsel %vm979_vm6, %v1125_v9, %v1127_v53  ;;  %v1108_v33 = vld [vmem:[#allocation2] sm:$0x1] }
 0x1c4   : > { %vm1096_vm4 = vcmp.eq.f32.partialorder %v2705_v60, inf  ;;  %vm1098_vm2 = vcmp.eq.f32.partialorder %v2705_v60, 0.0  ;;  %v1249_v56 = vrot.slane %v1248_v30, 1  ;;  %v1154_v6 = vsel %vm1152_vm9, %v1128_v49, 0.0 }
 0x1c5   : > { %v1102_v63 = vmul.f32 %v1630_v4, %v2693_v61  ;;  %v1272_v17 = vrot.slane %v1271_v57, 4  ;;  %v1280_v37 = vadd.f32 %v1268_v21, %v1200_v20  ;;  %v1632_v3 = vpop.eup %1631  ;;  %v1155_v29 = vadd.f32 %v1154_v6, %v1153_v45  ;;  %v1111_v4 = vld [vmem:[#allocation2 + $0x3] sm:$0x1] }
 0x1c6   : > { %v1099_v58 = vand.u32 2147483648, %v2705_v60  ;;  %v1169_v34 = vrot.slane %v1168_v0, 1  ;;  %v1178_v12 = vrot.slane %v1177_v8, 1  ;;  %v1095_v18 = vmul.f32 %v1632_v3, %v2705_v60 }
 0x1c7   : > { %v1104_v24 = vsel %vm1103_vm15, %v2693_v61, %v1102_v63  ;;  %v1273_v44 = vadd.f32 %v1272_v17, %v1271_v57  ;;  %1284 = vst.msk [vmem:[#allocation3 + $0x2] sm:$0x1] %vm245_vm1, %v1280_v37  ;;  %v1250_v36 = vadd.f32 %v1249_v56, %v1248_v30  ;;  %v1156_v2 = vrot.slane %v1155_v29, 4 }
 0x1c8   : > { %v1107_v38 = vsel %vm1105_vm0, %v1106_v52, %v1104_v24  ;;  %v1310_v54 = vld [vmem:[#allocation3 + $0x1] sm:$0x1]  ;;  %v1170_v16 = vadd.f32 %v1169_v34, %v1168_v0  ;;  %v1179_v28 = vadd.f32 %v1178_v12, %v1177_v8  ;;  %v1097_v51 = vsel %vm1096_vm4, %v2705_v60, %v1095_v18 }
 0x1c9   : > { %v1142_v43 = vrot.slane %v1107_v38, 1  ;;  %v1274_v27 = vrot.slane %v1273_v44, 2  ;;  %v1316_v39 = vsel %vm245_vm1, %v1310_v54, 0.0  ;;  %v1157_v32 = vadd.f32 %v1156_v2, %v1155_v29 }
 0x1ca   : > { %v1100_v25 = vsel %vm1098_vm2, %v1099_v58, %v1097_v51  ;;  %1317 = vadd.xlane.f32.xlu1 %v1316_v39  ;;  %v1190_v40 = vadd.f32 %v1170_v16, %v1109_v50  ;;  %v1191_v61 = vadd.f32 %v1179_v28, %v1110_v41  ;;  %v1139_v47 = vrot.slane %v2663_v1, 1 }
 0x1cb   : > { %v1140_v22 = vrot.slane %v1100_v25, 1  ;;  %v1275_v13 = vadd.f32 %v1274_v27, %v1273_v44  ;;  %v1278_v52 = vadd.f32 %v1250_v36, %v1198_v10  ;;  %v1158_v23 = vrot.slane %v1157_v32, 2 }
 0x1cc   : > { %1195 = vst.msk [vmem:[#allocation2 + $0x1] sm:$0x1] %vm245_vm1, %v1190_v40  ;;  %1196 = vst.msk [vmem:[#allocation2 + $0x2] sm:$0x1] %vm245_vm1, %v1191_v61  ;;  %vm1374_vm7 = vcmask 1041409   ;;  %vm1377_vm12 = vcmask 1042434  }
 0x1cd   : > { %v1141_v48 = vsel %vm979_vm6, %v1139_v47, %v1140_v22  ;;  %v1143_v7 = vsel %vm979_vm6, %v1140_v22, %v1142_v43  ;;  %1282 = vst.msk [vmem:[#allocation3] sm:$0x1] %vm245_vm1, %v1278_v52  ;;  %v1276_v60 = vrot.slane %v1275_v13, 1  ;;  %v1159_v9 = vadd.f32 %v1158_v23, %v1157_v32 }
 0x1ce   : > { %v1180_v55 = vsel %vm1152_vm9, %v1141_v48, 0.0  ;;  %v1181_v14 = vsel %vm1152_vm9, %v1143_v7, 0.0  ;;  %v1311_v1 = vld [vmem:[#allocation3 + $0x2] sm:$0x1]  ;;  %vm1380_vm13 = vcmask 1043459   ;;  %vm1389_vm14 = vcmask 24576  }
 0x1cf   : > { %v1182_v15 = vadd.f32 %v1181_v14, %v1180_v55  ;;  %v1319_v42 = vsel %vm245_vm1, %v1311_v1, 0.0  ;;  %v1277_v5 = vadd.f32 %v1276_v60, %v1275_v13  ;;  %v1160_v35 = vrot.slane %v1159_v9, 1 }
 0x1d0   : > { %1320 = vadd.xlane.f32.xlu0 %v1319_v42 }
 0x1d1   : > { %v1183_v62 = vrot.slane %v1182_v15, 4  ;;  %v1281_v11 = vadd.f32 %v1277_v5, %v1201_v59  ;;  %v1161_v46 = vadd.f32 %v1160_v35, %v1159_v9 }
 0x1d3   : > { %v1184_v26 = vadd.f32 %v1183_v62, %v1182_v15  ;;  %v1290_v19 = vld [vmem:[#allocation2 + $0x1] sm:$0x1]  ;;  %v1291_v53 = vld [vmem:[#allocation2 + $0x2] sm:$0x1]  ;;  %1285 = vst.msk [vmem:[#allocation3 + $0x3] sm:$0x1] %vm245_vm1, %v1281_v11  ;;  %v1189_v31 = vadd.f32 %v1161_v46, %v1108_v33  ;;  %v1382_v15 = vlaneseq }
 0x1d4   : > { %v1296_v45 = vsel %vm245_vm1, %v1290_v19, 0.0  ;;  %v1299_v30 = vsel %vm245_vm1, %v1291_v53, 0.0  ;;  %v1309_v57 = vld [vmem:[#allocation3] sm:$0x1] }
 0x1d5   : > { %v1185_v20 = vrot.slane %v1184_v26, 2  ;;  %1297 = vadd.xlane.f32.xlu0 %v1296_v45  ;;  %1300 = vadd.xlane.f32.xlu1 %v1299_v30  ;;  %1194 = vst.msk [vmem:[#allocation2] sm:$0x1] %vm245_vm1, %v1189_v31  ;;  %v1313_v0 = vsel %vm245_vm1, %v1309_v57, 0.0  ;;  %v1385_v19 = vshrl.u32 %v1382_v15, 7 }
 0x1d7   : > { %v1186_v21 = vadd.f32 %v1185_v20, %v1184_v26  ;;  %v1383_v26 = vand.u32 127, %v1382_v15 }
 0x1d9   : > { %1314 = vadd.xlane.f32.xlu1 %v1313_v0  ;;  %v1187_v8 = vrot.slane %v1186_v21, 1 }
 0x1da   : > { %v1312_v3 = vld [vmem:[#allocation3 + $0x3] sm:$0x1] }
 0x1db   : > { %v1188_v49 = vadd.f32 %v1187_v8, %v1186_v21  ;;  %v1322_v29 = vsel %vm245_vm1, %v1312_v3, 0.0  ;;  %v1386_v8 = vsub.s32 %v1383_v26, %v1385_v19 }
 0x1dc   : > { %v1289_v56 = vld [vmem:[#allocation2] sm:$0x1] }
 0x1dd   : > { %v1192_v6 = vadd.f32 %v1188_v49, %v1111_v4  ;;  %v1293_v63 = vsel %vm245_vm1, %v1289_v56, 0.0 }
 0x1de   : > { %1294 = vadd.xlane.f32.xlu0 %v1293_v63 }
 0x1df   : > { %1197 = vst.msk [vmem:[#allocation2 + $0x3] sm:$0x1] %vm245_vm1, %v1192_v6 }
 0x1e6   : > { %v1292_v17 = vld [vmem:[#allocation2 + $0x3] sm:$0x1] }
 0x1e7   : > { %v1302_v37 = vsel %vm245_vm1, %v1292_v17, 0.0 }
 0x1e8   : > { %1303 = vadd.xlane.f32.xlu0 %v1302_v37 }
 0x1ec   : > { %1323 = vadd.xlane.f32.xlu0 %v1322_v29 }
 0x257   : > { %v1318_v34 = vpop.xlane.xlu1 %1317 }
 0x258   : > { %v1326_v41 = vmul.f32 0.00390625, %v1318_v34 }
 0x25d   : > { %v1321_v58 = vpop.xlane.xlu0 %1320 }
 0x25e   : > { %v1327_v16 = vmul.f32 0.00390625, %v1321_v58 }
 0x262   : > { %v1298_v12 = vpop.xlane.xlu0 %1297  ;;  %v1301_v24 = vpop.xlane.xlu1 %1300 }
 0x263   : > { %v1306_v18 = vmul.f32 0.00390625, %v1298_v12  ;;  %v1307_v44 = vmul.f32 0.00390625, %v1301_v24 }
 0x265   : > { %v1330_v50 = vmul.f32 %v1306_v18, %v1306_v18  ;;  %v1331_v36 = vmul.f32 %v1307_v44, %v1307_v44 }
 0x266   : > { %v1315_v38 = vpop.xlane.xlu1 %1314 }
 0x267   : > { %v1334_v2 = vsub.f32 %v1326_v41, %v1330_v50  ;;  %v1335_v10 = vsub.f32 %v1327_v16, %v1331_v36  ;;  %v1325_v51 = vmul.f32 0.00390625, %v1315_v38 }
 0x269   : > { %v1338_v27 = vmax.f32 %v1334_v2, 0.0  ;;  %v1339_v32 = vmax.f32 %v1335_v10, 0.0 }
 0x26b   : > { %v1295_v54 = vpop.xlane.xlu0 %1294  ;;  %1633 = vrsqrt.f32 %v1338_v27  ;;  %vm1350_vm1 = vcmp.eq.f32.partialorder %v1338_v27, inf  ;;  %v1353_v59 = vand.u32 2147483648, %v1338_v27  ;;  %vm1352_vm9 = vcmp.eq.f32.partialorder %v1338_v27, 0.0 }
 0x26c   : > { %v1305_v28 = vmul.f32 0.00390625, %v1295_v54  ;;  %vm1357_vm5 = vcmp.eq.f32.partialorder %v1339_v32, inf  ;;  %v1360_v33 = vand.u32 2147483648, %v1339_v32  ;;  %vm1359_vm8 = vcmp.eq.f32.partialorder %v1339_v32, 0.0 }
 0x26e   : > { %v1329_v43 = vmul.f32 %v1305_v28, %v1305_v28 }
 0x270   : > { %v1333_v39 = vsub.f32 %v1325_v51, %v1329_v43 }
 0x272   : > { %v1337_v25 = vmax.f32 %v1333_v39, 0.0 }
 0x274   : > { %1635 = vrsqrt.f32 %v1337_v25  ;;  %vm1343_vm6 = vcmp.eq.f32.partialorder %v1337_v25, inf  ;;  %v1346_v62 = vand.u32 2147483648, %v1337_v25  ;;  %vm1345_vm3 = vcmp.eq.f32.partialorder %v1337_v25, 0.0 }
 0x275   : > { %v1304_v40 = vpop.xlane.xlu0 %1303  ;;  %1637 = vrsqrt.f32 %v1339_v32  ;;  %v1634_v23 = vpop.eup %1633 }
 0x276   : > { %v1308_v61 = vmul.f32 0.00390625, %v1304_v40  ;;  %v1349_v55 = vmul.f32 %v1634_v23, %v1338_v27 }
 0x278   : > { %v1332_v22 = vmul.f32 %v1308_v61, %v1308_v61  ;;  %v1351_v9 = vsel %vm1350_vm1, %v1338_v27, %v1349_v55 }
 0x279   : > { %v1324_v47 = vpop.xlane.xlu0 %1323  ;;  %v1354_v5 = vsel %vm1352_vm9, %v1353_v59, %v1351_v9 }
 0x27a   : > { %v1328_v13 = vmul.f32 0.00390625, %v1324_v47  ;;  %v1373_v30 = vrot.slane %v1354_v5, 7 }
 0x27c   : > { %v1336_v52 = vsub.f32 %v1328_v13, %v1332_v22 }
 0x27e   : > { %v1340_v48 = vmax.f32 %v1336_v52, 0.0  ;;  %v1636_v7 = vpop.eup %1635 }
 0x27f   : > { %v1638_v60 = vpop.eup %1637  ;;  %v1342_v14 = vmul.f32 %v1636_v7, %v1337_v25 }
 0x280   : > { %1639 = vrsqrt.f32 %v1340_v48  ;;  %v1356_v1 = vmul.f32 %v1638_v60, %v1339_v32  ;;  %vm1364_vm10 = vcmp.eq.f32.partialorder %v1340_v48, inf  ;;  %v1367_v31 = vand.u32 2147483648, %v1340_v48 }
 0x281   : > { %v1344_v42 = vsel %vm1343_vm6, %v1337_v25, %v1342_v14  ;;  %vm1366_vm11 = vcmp.eq.f32.partialorder %v1340_v48, 0.0 }
 0x282   : > { %v1358_v35 = vsel %vm1357_vm5, %v1339_v32, %v1356_v1  ;;  %v1347_v46 = vsel %vm1345_vm3, %v1346_v62, %v1344_v42 }
 0x283   : > { %v1361_v45 = vsel %vm1359_vm8, %v1360_v33, %v1358_v35  ;;  %v1375_v57 = vsel %vm1374_vm7, %v1373_v30, %v1347_v46 }
 0x284   : > { %v1376_v0 = vrot.slane %v1361_v45, 6 }
 0x286   : > { %v1378_v49 = vsel %vm1377_vm12, %v1376_v0, %v1375_v57 }
 0x28a   : > { %v1640_v11 = vpop.eup %1639 }
 0x28b   : > { %v1363_v53 = vmul.f32 %v1640_v11, %v1340_v48 }
 0x28d   : > { %v1365_v20 = vsel %vm1364_vm10, %v1340_v48, %v1363_v53 }
 0x28e   : > { %v1368_v21 = vsel %vm1366_vm11, %v1367_v31, %v1365_v20 }
 0x28f   : > { %v1379_v4 = vrot.slane %v1368_v21, 5 }
 0x291   : > { %v1381_v56 = vsel %vm1380_vm13, %v1379_v4, %v1378_v49 }
 0x292   : > { %v1387_v6 = vrot.slane %v1381_v56, %v1386_v8 }
 0x294   : > { %1390 = vst.msk [vmem:[%s237_s7] sm:$0x1] %vm1389_vm14, %v1387_v6 }
 0x295   : > { %1714 = shalt.err (!%p1711_p9)
}
 0x296   : > { %s1715_s6 = scalar_lea.hbm %s2781_s20, 16  ;;  %s1719_s15 = scalar_lea.hbm %s2832_s2, 32 }
 0x297   : > { %p1716_p1 = scmp.ne.s32.totalorder %s2781_s20, %s1715_s6  ;;  %p1720_p5 = scmp.lt.u32.totalorder %s2781_s20, %s2832_s2 }
 0x298   : > { %p1721_p4 = scmp.lt.u32.totalorder %s1719_s15, %s1715_s6  ;;  %p1723_p0 = scmp.lt.u32.totalorder %s1715_s6, %s2781_s20 }
 0x299   : > { %p1717_p6 = pnand %p1716_p1, %p2843_p3 }
 0x29a   : > { %p1722_p8 = por %p1721_p4, %p1720_p5 }
 0x29b   : > { %p1718_p2 = pneg %p1717_p6 }
 0x29c   : > { %p1724_p11 = por %p1723_p0, %p1722_p8 }
 0x29e   : > { %p1725_p13 = pnand %p1724_p11, %p1718_p2 }
 0x2a0   : > { %1728 = shalt.err (!%p1725_p13)
}
 0x2a1   : > { %1537 = dma.vmem_to_hbm [thread:$0]  (%p2843_p3), %s2783_s8, 16, %s2781_s20, %s1392_s4  }
 0x2a2 PF: > { %s1417_s26 = sand.u32 1, %s1767_s9   ;;  %p2844_p7 = scmp.ne.s32.totalorder %s2838_s24, 0 }
 0x2a3   : > { %p2845_p10 = scmp.ge.s32.totalorder %s1787_s14, 2  ;;  %s1418_s30 = scalar_lea.sflag [#allocation6], %s1417_s26 }
 0x2a5   : > { %p1547_p12 = pnand %p2845_p10, %p2844_p7 }
 0x2a7   : > { %1762 = dma.done.wait (!%p1547_p12), %s1418_s30, 16  }
 0x2a8   : > { %1764 = vsyncadd (!%p1547_p12), %s1418_s30, 4294967280  ;;  %s21_s14 = sadd.s32 1, %s1787_s14   ;;  %s2846_s9 = smov %s1771_s10 }
 0x2a9   : > { %p18_p9 = scmp.ge.s32.totalorder %s21_s14, 4   ;;  %s2847_s10 = smov %s1775_s11 }
 0x2aa   : > { %s2848_s11 = smov %s1872_s23  ;;  %s2849_s12 = smov %s1783_s13 }
 0x2ab   : > { %s2850_s13 = smov %s2852_s17  ;;  %20 = sbr.rel (!%p18_p9) target bundleno = 8 (0x8), region = 94 }
 0x2b2   :  { %1422 = vsyncpa [#allocation5], 1 }
 0x2b3   :  { %1424 = vsyncpa [#allocation5 + $0x1], 1 }
 0x2b4   :  { %1425 = vsyncpa [#allocation8], 1 }
 0x2b5   :  { %1427 = vsyncpa [#allocation8 + $0x1], 1 }
 0x2b6   :  { %1428 = vsyncpa [#allocation6], 1 }
 0x2b7   :  { %1430 = vsyncpa [#allocation6 + $0x1], 1 }

</bundles_post_ra>
